<compile_context>
chip_gen: v7x
topology: tpu7x:2x2x1
jax: 0.10.0
libtpu: 0.0.40
codegen_flags: <defaults>
</compile_context>

<pallas_src>
import math
from functools import partial

import jax
import jax.numpy as jnp
from jax.experimental import pallas as pl
from jax.experimental.pallas import tpu as pltpu


def tempolnet_kernel(p_ref, w1_ref, bn1s_ref, bn1o_ref, w2_ref, bn2s_ref,
                     bn2o_ref, out_ref, *, seg):
    # p_ref:    (M, DIM)     bf16 pooled activations (+tem1), M = block_batch*SEG
    # w1_ref:   (DIM, 3*DIM) bf16 (1,3)-conv taps stacked along N, (in, out)
    # bn1s/o:   (1, DIM)     f32 folded eval BN1 (conv1 bias folded into offset)
    # w2_ref:   (DIM, 2*DIM) bf16 1x1 conv, (in, out)
    # bn2s/o:   (1, 2*DIM)   f32 folded eval BN2 (conv2 bias folded into offset)
    # out_ref:  (M, 2*DIM)   f32
    m, dim = p_ref.shape

    # Conv2d(dim, dim, (1,3), padding=(0,1)) in shift-after-matmul form:
    # one bf16 MXU matmul with the three taps stacked along the output axis ...
    q = jnp.dot(p_ref[...], w1_ref[...], preferred_element_type=jnp.float32)

    # ... then sublane rolls (XLU slot) + per-row edge masks reproduce the
    # neighbor taps and the zero padding.  Rows are (sample, seg) flattened, so
    # the rows that wrapped across a sample/segment boundary are exactly the
    # masked ones.
    seg_pos = jax.lax.broadcasted_iota(jnp.int32, (m, 1), 0) % seg
    keep_l = (seg_pos != 0).astype(jnp.float32)          # row has a left neighbor
    keep_r = (seg_pos != seg - 1).astype(jnp.float32)    # row has a right neighbor

    y = (q[:, dim:2 * dim]
         + keep_l * pltpu.roll(q[:, :dim], shift=1, axis=0)        # tap 0: x[w-1]
         + keep_r * pltpu.roll(q[:, 2 * dim:], shift=m - 1, axis=0))  # tap 2: x[w+1]
    # eval-mode BatchNorm2d (folded, conv bias in offset) + ReLU.
    y = jnp.maximum(y * bn1s_ref[...] + bn1o_ref[...], 0.0)
    # Dropout2d(0.2): identity in eval mode.

    # 1x1 conv dim -> 2*dim, BN2 (folded) + ReLU; lane-dense (M, 2*DIM) store.
    z = jnp.dot(y.astype(w2_ref.dtype), w2_ref[...],
                preferred_element_type=jnp.float32)
    out_ref[...] = jnp.maximum(z * bn2s_ref[...] + bn2o_ref[...], 0.0)


def _vmem_config():
    """(block-sizing budget, vmem_limit_bytes), adapted to the TPU generation."""
    try:
        cap = getattr(pltpu.get_tpu_info(), "vmem_capacity_bytes", 64 * 1024 * 1024)
    except Exception:
        cap = 64 * 1024 * 1024
    if cap >= 100 * 1024 * 1024:                      # v5e / v6e: 128 MiB physical
        return 48 * 1024 * 1024, 64 * 1024 * 1024
    return 24 * 1024 * 1024, 40 * 1024 * 1024         # v7x: 64 MiB physical


def _pick_block_batch(bs, seg, dim, budget_bytes):
    """Largest batch block fitting the VMEM budget, with M = bb*seg a multiple of
    16 (128 preferred) and grid length >= 2 so v7x's two TensorCores share work."""
    per_row = dim * (2 * 2          # bf16 input block, double-buffered
                     + 2 * 2 * 4    # f32 (M, 2*dim) output block, double-buffered
                     + 3 * 4        # f32 (M, 3*dim) conv-tap intermediate
                     + 1 * 4        # f32 (M, dim) post-BN1 activation
                     + 2 * 4)       # f32 (M, 2*dim) pre-BN2 activation
    cap = max(1, budget_bytes // (seg * per_row))
    best_key, best_bb = None, None
    for bb in range(1, bs + 1):
        if bs % bb or bb > cap or (bb * seg) % 16:
            continue
        key = (bs // bb >= 2,            # >= 2 grid steps (v7x: 2 TensorCores)
               (bb * seg) % 128 == 0,    # sublane/lane-friendly M
               bb)                       # otherwise: as large as possible
        if best_key is None or key > best_key:
            best_key, best_bb = key, bb
    return best_bb if best_bb is not None else bs


def tempolnet_forward(x_nchw, params, *, block_batch=None):
    bs, dim, h, seg = x_nchw.shape
    assert seg == 20, "AdaptiveMaxPool2d((1,20)) pass-through along W requires seg == 20"
    eps = 1e-5

    budget, vmem_limit = _vmem_config()
    if block_batch is None:
        block_batch = _pick_block_batch(bs, seg, dim, budget)
    assert bs % block_batch == 0, (bs, block_batch)
    m = block_batch * seg
    assert m % 16 == 0 or block_batch == bs, (m, block_batch)

    # ---------------- parameter-only preprocessing (x-independent) ----------------
    # tem_embed applied to the one-hot identity collapses to two dense layers.
    hmid = jax.nn.relu(params["te_w1"].T + params["te_b1"][None, :])          # (SEG, 64)
    tem1 = jax.nn.relu(hmid @ params["te_w2"].T + params["te_b2"][None, :])   # (SEG, DIM)

    # eval-mode BatchNorm folded; conv biases folded into the BN offsets.
    s1 = params["bn1_gamma"] / jnp.sqrt(params["bn1_var"] + eps)
    o1 = params["bn1_beta"] - params["bn1_mean"] * s1 + params["c1_b"] * s1
    s2 = params["bn2_gamma"] / jnp.sqrt(params["bn2_var"] + eps)
    o2 = params["bn2_beta"] - params["bn2_mean"] * s2 + params["c2_b"] * s2

    # (1,3)-conv taps stacked along N ((in, out) layout): tap 0 -> x[w-1],
    # tap 1 -> x[w], tap 2 -> x[w+1]; the kernel shifts AFTER the matmul.
    w1stack = jnp.concatenate([params["c1_w"][:, :, k].T for k in range(3)],
                              axis=1).astype(jnp.bfloat16)                    # (DIM, 3*DIM)
    w2 = params["c2_w"].T.astype(jnp.bfloat16)                                # (DIM, 2*DIM)

    # -------------- x-dependent preprocessing (one fused pass over x) -------------
    # AdaptiveMaxPool2d((1, SEG)) with W == SEG is a pure max over H.  Pooling in
    # NCHW first means the transpose / tem1 add / bf16 cast touch an H-times
    # smaller tensor, and the kernel only streams the pooled bf16 slab from HBM.
    pooled = jnp.max(x_nchw.astype(jnp.float32), axis=2)                      # (BS, DIM, SEG)
    pooled = pooled + tem1.T[None, :, :]                                      # max(x+c)=max(x)+c
    p = jnp.transpose(pooled, (0, 2, 1)).reshape(bs * seg, dim).astype(jnp.bfloat16)

    const2d = lambda i: (0, 0)
    out = pl.pallas_call(
        partial(tempolnet_kernel, seg=seg),
        grid=(bs // block_batch,),
        in_specs=[
            pl.BlockSpec((m, dim), lambda i: (i, 0)),     # pooled slab (bf16)
            pl.BlockSpec((dim, 3 * dim), const2d),        # stacked (1,3) conv taps
            pl.BlockSpec((1, dim), const2d),              # bn1 scale
            pl.BlockSpec((1, dim), const2d),              # bn1 offset (+conv1 bias)
            pl.BlockSpec((dim, 2 * dim), const2d),        # 1x1 conv weight
            pl.BlockSpec((1, 2 * dim), const2d),          # bn2 scale
            pl.BlockSpec((1, 2 * dim), const2d),          # bn2 offset (+conv2 bias)
        ],
        out_specs=pl.BlockSpec((m, 2 * dim), lambda i: (i, 0)),
        out_shape=jax.ShapeDtypeStruct((bs * seg, 2 * dim), jnp.float32),
        compiler_params=pltpu.CompilerParams(
            dimension_semantics=("parallel",),
            vmem_limit_bytes=vmem_limit),
    )(p, w1stack,
      s1[None, :].astype(jnp.float32), o1[None, :].astype(jnp.float32),
      w2,
      s2[None, :].astype(jnp.float32), o2[None, :].astype(jnp.float32))

    # back to PyTorch NCHW: (BS, 2*DIM, 1, SEG)
    return jnp.transpose(out.reshape(bs, seg, 2 * dim), (0, 2, 1))[:, :, None, :]


def init_params(key, seg, dim):
    """Deterministic synthetic parameters mirroring TempolNet.__init__ shapes."""
    k = jax.random.split(key, 8)
    p = {}
    # embed(seg, dim, norm=False, bias=True): cnn1x1(seg,64), cnn1x1(64,dim)
    p["te_w1"] = math.sqrt(2.0 / 64) * jax.random.normal(k[0], (64, seg))
    p["te_b1"] = 0.1 * jax.random.normal(k[1], (64,))
    p["te_w2"] = math.sqrt(2.0 / dim) * jax.random.normal(k[2], (dim, 64))
    p["te_b2"] = 0.1 * jax.random.normal(k[3], (dim,))
    # local(dim, 2*dim): Conv2d(dim, dim, (1,3)), Conv2d(dim, 2*dim, 1)
    p["c1_w"] = math.sqrt(2.0 / (3 * dim)) * jax.random.normal(k[4], (dim, dim, 3))
    p["c1_b"] = 0.1 * jax.random.normal(k[5], (dim,))
    p["c2_w"] = math.sqrt(2.0 / (2 * dim)) * jax.random.normal(k[6], (2 * dim, dim))
    p["c2_b"] = 0.1 * jax.random.normal(k[7], (2 * dim,))
    # BatchNorm2d default init / running stats
    p["bn1_gamma"] = jnp.ones((dim,));      p["bn1_beta"] = jnp.zeros((dim,))
    p["bn1_mean"] = jnp.zeros((dim,));      p["bn1_var"] = jnp.ones((dim,))
    p["bn2_gamma"] = jnp.ones((2 * dim,));  p["bn2_beta"] = jnp.zeros((2 * dim,))
    p["bn2_mean"] = jnp.zeros((2 * dim,));  p["bn2_var"] = jnp.ones((2 * dim,))
    return {name: v.astype(jnp.float32) for name, v in p.items()}


def ref_forward(x_nchw, params):
    """Pure-JAX f32 reference mirroring the PyTorch (eval-mode) forward, in NCHW."""
    bs, dim, h, seg = x_nchw.shape
    eps = 1e-5
    # tem_embed on identity one-hot
    hmid = jax.nn.relu(params["te_w1"] + params["te_b1"][:, None])            # (64, seg)
    tem1 = jax.nn.relu(params["te_w2"] @ hmid + params["te_b2"][:, None])     # (dim, seg)
    x = x_nchw + tem1[None, :, None, :]
    # AdaptiveMaxPool2d((1, 20)) with W == 20
    p = jnp.max(x, axis=2, keepdims=True)                                     # (bs, dim, 1, 20)
    # Conv2d(dim, dim, (1,3), padding=(0,1))
    pp = jnp.pad(p, ((0, 0), (0, 0), (0, 0), (1, 1)))
    w = params["c1_w"]                                                        # (out, in, 3)
    y = sum(jnp.einsum("oi,bixw->boxw", w[:, :, kk], pp[:, :, :, kk:kk + seg])
            for kk in range(3))
    y = y + params["c1_b"][None, :, None, None]
    s1 = params["bn1_gamma"] / jnp.sqrt(params["bn1_var"] + eps)
    o1 = params["bn1_beta"] - params["bn1_mean"] * s1
    y = jax.nn.relu(y * s1[None, :, None, None] + o1[None, :, None, None])
    # Dropout2d: identity (eval)
    z = jnp.einsum("oi,bixw->boxw", params["c2_w"], y) + params["c2_b"][None, :, None, None]
    s2 = params["bn2_gamma"] / jnp.sqrt(params["bn2_var"] + eps)
    o2 = params["bn2_beta"] - params["bn2_mean"] * s2
    return jax.nn.relu(z * s2[None, :, None, None] + o2[None, :, None, None])


if __name__ == "__main__":
    BS, DIM, H, SEG = 16, 128, 4, 20     # seg=20 matches AdaptiveMaxPool2d((1,20))
    key = jax.random.PRNGKey(0)
    k_x, k_p = jax.random.split(key)
    x = jax.random.normal(k_x, (BS, DIM, H, SEG), dtype=jnp.float32)
    params = init_params(k_p, SEG, DIM)

    out = jax.block_until_ready(tempolnet_forward(x, params))  # auto block_batch=8, grid=(2,)
    assert out.shape == (BS, 2 * DIM, 1, SEG), out.shape

    ref = jax.block_until_ready(ref_forward(x, params))
    # bf16 activation/weight streams vs. the pure-f32 reference -> loosened tolerance.
    assert jnp.allclose(out, ref, rtol=5e-2, atol=7.5e-2), (
        float(jnp.max(jnp.abs(out - ref))))

    print("KERNEL_OK")
</pallas_src>

<mosaic_0001>
module attributes {stable_mosaic.version = 11 : i64} {
  func.func @tempolnet_kernel(%arg0: i32, %arg1: memref<160x128xbf16, #tpu.memory_space<vmem>>, %arg2: memref<128x384xbf16, #tpu.memory_space<vmem>>, %arg3: memref<1x128xf32, #tpu.memory_space<vmem>>, %arg4: memref<1x128xf32, #tpu.memory_space<vmem>>, %arg5: memref<128x256xbf16, #tpu.memory_space<vmem>>, %arg6: memref<1x256xf32, #tpu.memory_space<vmem>>, %arg7: memref<1x256xf32, #tpu.memory_space<vmem>>, %arg8: memref<160x256xf32, #tpu.memory_space<vmem>>) attributes {dimension_semantics = [#tpu.dimension_semantics<parallel>], iteration_bounds = array<i64: 2>, scalar_prefetch = 0 : i64, scratch_operands = 0 : i64, tpu.core_type = #tpu.core_type<tc>, window_params = [{transform_indices = @transform_0, window_bounds = array<i64: 160, 128>}, {pipeline_mode = #tpu.pipeline_mode<synchronous>, transform_indices = @transform_1, window_bounds = array<i64: 128, 384>}, {pipeline_mode = #tpu.pipeline_mode<synchronous>, transform_indices = @transform_2, window_bounds = array<i64: 1, 128>}, {pipeline_mode = #tpu.pipeline_mode<synchronous>, transform_indices = @transform_3, window_bounds = array<i64: 1, 128>}, {pipeline_mode = #tpu.pipeline_mode<synchronous>, transform_indices = @transform_4, window_bounds = array<i64: 128, 256>}, {pipeline_mode = #tpu.pipeline_mode<synchronous>, transform_indices = @transform_5, window_bounds = array<i64: 1, 256>}, {pipeline_mode = #tpu.pipeline_mode<synchronous>, transform_indices = @transform_6, window_bounds = array<i64: 1, 256>}, {transform_indices = @transform_7, window_bounds = array<i64: 160, 256>}]} {
    %c0 = arith.constant 0 : index
    %c0_0 = arith.constant 0 : index
    %0 = vector.load %arg1[%c0, %c0_0] : memref<160x128xbf16, #tpu.memory_space<vmem>>, vector<160x128xbf16>
    %c0_1 = arith.constant 0 : index
    %c0_2 = arith.constant 0 : index
    %1 = vector.load %arg2[%c0_1, %c0_2] : memref<128x384xbf16, #tpu.memory_space<vmem>>, vector<128x384xbf16>
    %cst = arith.constant dense<0.000000e+00> : vector<160x384xf32>
    %2 = tpu.matmul %0, %1, %cst {dimension_numbers = #tpu.dot_dimension_numbers<[1], [0], [0], [1], [0, 0, 1, 1], [], []>} : vector<160x128xbf16>, vector<128x384xbf16>, vector<160x384xf32> -> vector<160x384xf32>
    %3 = tpu.iota {dimensions = array<i32: 0>} : vector<160x1xi32>
    %c20_i32 = arith.constant 20 : i32
    %c0_i32 = arith.constant 0 : i32
    %4 = arith.cmpi eq, %c20_i32, %c0_i32 : i32
    %c1_i32 = arith.constant 1 : i32
    %5 = arith.select %4, %c1_i32, %c20_i32 : i32
    %6 = vector.broadcast %5 : i32 to vector<160x1xi32>
    %7 = arith.remsi %3, %6 : vector<160x1xi32>
    %c0_i32_3 = arith.constant 0 : i32
    %8 = vector.broadcast %c0_i32_3 : i32 to vector<160x1xi32>
    %9 = arith.cmpi ne, %7, %8 : vector<160x1xi32>
    %c0_i32_4 = arith.constant 0 : i32
    %10 = vector.broadcast %c0_i32_4 : i32 to vector<160x1xi32>
    %11 = arith.cmpi slt, %7, %10 : vector<160x1xi32>
    %c0_i32_5 = arith.constant 0 : i32
    %12 = arith.cmpi slt, %5, %c0_i32_5 : i32
    %13 = vector.broadcast %12 : i1 to vector<160x1xi1>
    %14 = vector.broadcast %13 : vector<160x1xi1> to vector<160x1xi1>
    %15 = arith.xori %11, %14 : vector<160x1xi1>
    %16 = arith.andi %15, %9 : vector<160x1xi1>
    %17 = vector.broadcast %5 : i32 to vector<160x1xi32>
    %18 = arith.addi %7, %17 : vector<160x1xi32>
    %19 = arith.select %16, %18, %7 : vector<160x1xi1>, vector<160x1xi32>
    %c0_i32_6 = arith.constant 0 : i32
    %20 = vector.broadcast %c0_i32_6 : i32 to vector<160x1xi32>
    %21 = arith.cmpi ne, %19, %20 : vector<160x1xi32>
    %22 = arith.extui %21 : vector<160x1xi1> to vector<160x1xi32>
    %23 = arith.sitofp %22 : vector<160x1xi32> to vector<160x1xf32>
    %c19_i32 = arith.constant 19 : i32
    %24 = vector.broadcast %c19_i32 : i32 to vector<160x1xi32>
    %25 = arith.cmpi ne, %19, %24 : vector<160x1xi32>
    %26 = arith.extui %25 : vector<160x1xi1> to vector<160x1xi32>
    %27 = arith.sitofp %26 : vector<160x1xi32> to vector<160x1xf32>
    %28 = vector.extract_strided_slice %2 {offsets = [0, 128], sizes = [160, 128], strides = [1, 1]} : vector<160x384xf32> to vector<160x128xf32>
    %29 = vector.extract_strided_slice %2 {offsets = [0, 0], sizes = [160, 128], strides = [1, 1]} : vector<160x384xf32> to vector<160x128xf32>
    %c1_i32_7 = arith.constant 1 : i32
    %30 = tpu.dynamic_rotate %29 by %c1_i32_7 dim 0 : vector<160x128xf32>, i32 -> vector<160x128xf32>
    %31 = vector.broadcast %23 : vector<160x1xf32> to vector<160x128xf32>
    %32 = arith.mulf %31, %30 : vector<160x128xf32>
    %33 = arith.addf %28, %32 : vector<160x128xf32>
    %34 = vector.extract_strided_slice %2 {offsets = [0, 256], sizes = [160, 128], strides = [1, 1]} : vector<160x384xf32> to vector<160x128xf32>
    %c159_i32 = arith.constant 159 : i32
    %35 = tpu.dynamic_rotate %34 by %c159_i32 dim 0 : vector<160x128xf32>, i32 -> vector<160x128xf32>
    %36 = vector.broadcast %27 : vector<160x1xf32> to vector<160x128xf32>
    %37 = arith.mulf %36, %35 : vector<160x128xf32>
    %38 = arith.addf %33, %37 : vector<160x128xf32>
    %c0_8 = arith.constant 0 : index
    %c0_9 = arith.constant 0 : index
    %39 = vector.load %arg3[%c0_8, %c0_9] : memref<1x128xf32, #tpu.memory_space<vmem>>, vector<1x128xf32>
    %40 = vector.broadcast %39 : vector<1x128xf32> to vector<160x128xf32>
    %41 = arith.mulf %38, %40 : vector<160x128xf32>
    %c0_10 = arith.constant 0 : index
    %c0_11 = arith.constant 0 : index
    %42 = vector.load %arg4[%c0_10, %c0_11] : memref<1x128xf32, #tpu.memory_space<vmem>>, vector<1x128xf32>
    %43 = vector.broadcast %42 : vector<1x128xf32> to vector<160x128xf32>
    %44 = arith.addf %41, %43 : vector<160x128xf32>
    %cst_12 = arith.constant 0.000000e+00 : f32
    %45 = vector.broadcast %cst_12 : f32 to vector<160x128xf32>
    %46 = arith.maximumf %44, %45 : vector<160x128xf32>
    %47 = arith.truncf %46 : vector<160x128xf32> to vector<160x128xbf16>
    %c0_13 = arith.constant 0 : index
    %c0_14 = arith.constant 0 : index
    %48 = vector.load %arg5[%c0_13, %c0_14] : memref<128x256xbf16, #tpu.memory_space<vmem>>, vector<128x256xbf16>
    %cst_15 = arith.constant dense<0.000000e+00> : vector<160x256xf32>
    %49 = tpu.matmul %47, %48, %cst_15 {dimension_numbers = #tpu.dot_dimension_numbers<[1], [0], [0], [1], [0, 0, 1, 1], [], []>} : vector<160x128xbf16>, vector<128x256xbf16>, vector<160x256xf32> -> vector<160x256xf32>
    %c0_16 = arith.constant 0 : index
    %c0_17 = arith.constant 0 : index
    %50 = vector.load %arg6[%c0_16, %c0_17] : memref<1x256xf32, #tpu.memory_space<vmem>>, vector<1x256xf32>
    %51 = vector.broadcast %50 : vector<1x256xf32> to vector<160x256xf32>
    %52 = arith.mulf %49, %51 : vector<160x256xf32>
    %c0_18 = arith.constant 0 : index
    %c0_19 = arith.constant 0 : index
    %53 = vector.load %arg7[%c0_18, %c0_19] : memref<1x256xf32, #tpu.memory_space<vmem>>, vector<1x256xf32>
    %54 = vector.broadcast %53 : vector<1x256xf32> to vector<160x256xf32>
    %55 = arith.addf %52, %54 : vector<160x256xf32>
    %cst_20 = arith.constant 0.000000e+00 : f32
    %56 = vector.broadcast %cst_20 : f32 to vector<160x256xf32>
    %57 = arith.maximumf %55, %56 : vector<160x256xf32>
    %c0_21 = arith.constant 0 : index
    %c0_22 = arith.constant 0 : index
    %58 = vector.load %arg8[%c0_21, %c0_22] : memref<160x256xf32, #tpu.memory_space<vmem>>, vector<160x256xf32>
    tpu.vector_store %arg8[%c0_21, %c0_22], %57 {strides = array<i32>} : memref<160x256xf32, #tpu.memory_space<vmem>>, vector<160x256xf32>,
    return
  }
  func.func @transform_0(%arg0: i32) -> (i32, i32) {
    %c0_i32 = arith.constant 0 : i32
    %c0_i32_0 = arith.constant 0 : i32
    return %arg0, %c0_i32 : i32, i32
  }
  func.func @transform_1(%arg0: i32) -> (i32, i32) {
    %c0_i32 = arith.constant 0 : i32
    %c0_i32_0 = arith.constant 0 : i32
    %c0_i32_1 = arith.constant 0 : i32
    return %c0_i32, %c0_i32_0 : i32, i32
  }
  func.func @transform_2(%arg0: i32) -> (i32, i32) {
    %c0_i32 = arith.constant 0 : i32
    %c0_i32_0 = arith.constant 0 : i32
    %c0_i32_1 = arith.constant 0 : i32
    return %c0_i32, %c0_i32_0 : i32, i32
  }
  func.func @transform_3(%arg0: i32) -> (i32, i32) {
    %c0_i32 = arith.constant 0 : i32
    %c0_i32_0 = arith.constant 0 : i32
    %c0_i32_1 = arith.constant 0 : i32
    return %c0_i32, %c0_i32_0 : i32, i32
  }
  func.func @transform_4(%arg0: i32) -> (i32, i32) {
    %c0_i32 = arith.constant 0 : i32
    %c0_i32_0 = arith.constant 0 : i32
    %c0_i32_1 = arith.constant 0 : i32
    return %c0_i32, %c0_i32_0 : i32, i32
  }
  func.func @transform_5(%arg0: i32) -> (i32, i32) {
    %c0_i32 = arith.constant 0 : i32
    %c0_i32_0 = arith.constant 0 : i32
    %c0_i32_1 = arith.constant 0 : i32
    return %c0_i32, %c0_i32_0 : i32, i32
  }
  func.func @transform_6(%arg0: i32) -> (i32, i32) {
    %c0_i32 = arith.constant 0 : i32
    %c0_i32_0 = arith.constant 0 : i32
    %c0_i32_1 = arith.constant 0 : i32
    return %c0_i32, %c0_i32_0 : i32, i32
  }
  func.func @transform_7(%arg0: i32) -> (i32, i32) {
    %c0_i32 = arith.constant 0 : i32
    %c0_i32_0 = arith.constant 0 : i32
    return %arg0, %c0_i32 : i32, i32
  }
}

</mosaic_0001>

<bundles_post_ra>
// kernel: tpu_custom_call.1
= control target key start
LH: loop header
LB: loop body
LE: loop exit
PB: predicated region body
PF: predicated region fallthrough
CT: control target
= control target key end

     0   :  { %s3626_s0 = inlined_call_operand.hbm [shape: bf16[320,128], index: 0, kind: input, shape index: {}]   ;;  %s3627_s1 = inlined_call_operand.hbm [shape: bf16[128,384], index: 1, kind: input, shape index: {}]   ;;  %s3628_s2 = inlined_call_operand.vmem [shape: f32[1,128], index: 2, kind: input, shape index: {}]   ;;  %s3629_s3 = inlined_call_operand.vmem [shape: f32[1,128], index: 3, kind: input, shape index: {}]   ;;  %s3630_s4 = inlined_call_operand.hbm [shape: bf16[128,256], index: 4, kind: input, shape index: {}]   ;;  %s3631_s5 = inlined_call_operand.vmem [shape: f32[1,256], index: 5, kind: input, shape index: {}]   ;;  %s3632_s6 = inlined_call_operand.vmem [shape: f32[1,256], index: 6, kind: input, shape index: {}]   ;;  %s3633_s7 = inlined_call_operand.hbm [shape: f32[320,256], index: 7, kind: output, shape index: {}]  }
   0x1   :  { %3640 = sst [smem:[#allocation12_spill]] %s3627_s1 }
   0x2   :  { %12 = vsyncpa [#allocation3], 0 }
   0x3   :  { %14 = vsyncpa [#allocation3 + $0x1], 0 }
   0x4   :  { %15 = vsyncpa [#allocation6], 0 }
   0x5   :  { %16 = vsyncpa [#allocation4], 0 }
   0x6   :  { %18 = vsyncpa [#allocation4 + $0x1], 0  ;;  %s2619_s24 = smov 0   ;;  %s2621_s25 = smov 0  }
   0x7   :  { %s2623_s26 = smov 0   ;;  %s2625_s27 = smov 0  }
   0x8 LB: > { %s2640_s28 = sadd.s32 4294967295, %s2563_s27   ;;  %s2042_s29 = sadd.s32 4294967294, %s2563_s27   ;;  %s2563_s27 = sphi %s2625_s27, %s3667_s27   ;;  %s2559_s26 = sphi %s2623_s26, %s3666_s26   ;;  %s2555_s25 = sphi %s2621_s25, %s3665_s25   ;;  %s2551_s24 = sphi %s2619_s24, %s3664_s24  }
   0x9   : > { %p44_p0 = scmp.ne.s32.totalorder %s2555_s25, %s2551_s24  ;;  %p3634_p1 = scmp.eq.s32.totalorder %s2640_s28, 0 }
   0xa   : > { %p200_p3 = scmp.eq.s32.totalorder %s2042_s29, 1  ;;  %p2043_p5 = scmp.ge.s32.totalorder %s2563_s27, 1 }
   0xb   : > { %p2649_p4 = por %p3634_p1, %p44_p0  ;;  %p207_p7 = scmp.lt.s32.totalorder %s2563_s27, 3 }
   0xc   : > { %p2654_p6 = por %p200_p3, %p44_p0  ;;  %s2565_s10 = smov [#allocation5]  }
   0xd   : > { %s3641_s30 = scalar_select %p2649_p4, 1, 0 }
   0xe   : > { %s3642_s8 = scalar_select %p2654_p6, 1, 0 }
   0xf   : > { %p2659_p8 = pnand %p2043_p5, %p207_p7  ;;  %s219_s11 = sshll.u32 %s2565_s10, 4  ;;  %s2663_s11 = int_to_ptr.vmem [resolvable:$true] %s219_s11 }
  0x10   : > { %s2566_s13 = smov [#allocation7]   ;;  %s3645_s1 = sld [smem:[#allocation12_spill]] }
  0x11   : > { %p2276_p9 = pneg %p2659_p8  ;;  %s238_s14 = sshll.u32 %s2566_s13, 4  ;;  %s2674_s14 = int_to_ptr.vmem [resolvable:$true] %s238_s14 }
  0x13   : > { %p2670_p11 = pnand %p2276_p9, %p3634_p1 }
  0x15   : > { %p2409_p13 = pneg %p2670_p11 }
  0x16   : > { %s2407_s17 = scalar_lea.hbm %s3645_s1, 3072 }
  0x17   : > { %p2408_p12 = scmp.ne.s32.totalorder %s3645_s1, %s2407_s17  ;;  %p2414_p5 = scmp.lt.u32.totalorder %s2407_s17, %s3645_s1 }
  0x19   : > { %p2410_p0 = pnand %p2409_p13, %p2408_p12 }
  0x1b   : > { %p2411_p3 = pneg %p2410_p0 }
  0x1d   : > { %p2416_p7 = pnand %p2414_p5, %p2411_p3 }
  0x1f   : > { %2419 = shalt.err (!%p2416_p7)
}
  0x20   : > { %s2420_s22 = scalar_lea.vmem %s2663_s11, 3072  ;;  %p2428_p2 = scmp.lt.s32.totalorder %s2663_s11, %s2663_s11 }
  0x21   : > { %p2421_p9 = scmp.ne.s32.totalorder %s2663_s11, %s2420_s22  ;;  %p2429_p12 = scmp.lt.s32.totalorder %s2420_s22, %s2420_s22 }
  0x23   : > { %p2423_p10 = pnand %p2421_p9, %p2409_p13  ;;  %p2430_p0 = por %p2429_p12, %p2428_p2 }
  0x25   : > { %p2424_p1 = pneg %p2423_p10 }
  0x27   : > { %p2431_p6 = pnand %p2430_p0, %p2424_p1 }
  0x29   : > { %2434 = shalt.err (!%p2431_p6)
}
  0x2a   : > { %s2567_s23 = smov 192   ;;  %s2568_s29 = smov 12  }
  0x2b   : > { %2279 = dma.hbm_to_vmem [thread:$0]  (!%p2670_p11), %s3645_s1, 3072, %s2663_s11, [#allocation6], %s2567_s23, %s2567_s23, %s2568_s29  }
  0x2c   : > { %s2435_s17 = scalar_lea.hbm %s3630_s4, 2048 }
  0x2d   : > { %p2436_p2 = scmp.ne.s32.totalorder %s3630_s4, %s2435_s17  ;;  %p2442_p10 = scmp.lt.u32.totalorder %s2435_s17, %s3630_s4 }
  0x2f   : > { %p2438_p1 = pnand %p2436_p2, %p2409_p13 }
  0x31   : > { %p2439_p6 = pneg %p2438_p1 }
  0x33   : > { %p2444_p3 = pnand %p2442_p10, %p2439_p6 }
  0x35   : > { %2447 = shalt.err (!%p2444_p3)
}
  0x36   : > { %s2448_s11 = scalar_lea.vmem %s2674_s14, 2048  ;;  %p2456_p12 = scmp.lt.s32.totalorder %s2674_s14, %s2674_s14 }
  0x37   : > { %p2449_p5 = scmp.ne.s32.totalorder %s2674_s14, %s2448_s11  ;;  %p2457_p0 = scmp.lt.s32.totalorder %s2448_s11, %s2448_s11 }
  0x39   : > { %p2451_p7 = pnand %p2449_p5, %p2409_p13  ;;  %p2458_p2 = por %p2457_p0, %p2456_p12 }
  0x3b   : > { %p2452_p9 = pneg %p2451_p7 }
  0x3d   : > { %p2459_p1 = pnand %p2458_p2, %p2452_p9 }
  0x3f   : > { %2462 = shalt.err (!%p2459_p1)
}
  0x40   : > { %s2569_s22 = smov 128   ;;  %s2570_s23 = smov 8  }
  0x41   : > { %2282 = dma.hbm_to_vmem [thread:$0]  (!%p2670_p11), %s3630_s4, 2048, %s2674_s14, [#allocation6], %s2569_s22, %s2569_s22, %s2570_s23  }
  0x42   : > { %s2729_s13 = sadd.s32 1, %s2563_s27   ;;  %s31_s16 = sadd.s32 1, %s2559_s26 }
  0x43   : > { %s28_s15 = ssub.s32 %s2563_s27, %s2729_s13  ;;  %p38_p6 = scmp.ne.s32.totalorder %s2559_s26, %s2555_s25 }
  0x44   : > { %p29_p13 = scmp.eq.s32.totalorder %s28_s15, 0  ;;  %p39_p10 = scmp.eq.s32.totalorder %s2563_s27, 0 }
  0x45   : > { %p3646_p5 = scmp.eq.s32.totalorder %s2640_s28, 1  ;;  %p2293_p9 = scmp.lt.s32.totalorder %s2563_s27, 2 }
  0x46   : > { %s2738_s17 = scalar_select %p29_p13, %s2559_s26, %s31_s16  }
  0x47   : > { %p40_p3 = por %p39_p10, %p38_p6  ;;  %p2742_p7 = por %p3646_p5, %p38_p6 }
  0x48   : > { %s258_s12 = sand.u32 1, %s2559_s26   ;;  %s2147_s14 = smul.u32 1280, %s2563_s27 }
  0x49   : > { %s3647_s18 = scalar_select %p2742_p7, 1, 0 }
  0x4a   : > { %s2221_s19 = smul.u32 80, %s258_s12  ;;  %p2749_p11 = pnand %p2293_p9, %p40_p3 }
  0x4b   : > { %s2756_s22 = scalar_lea.hbm %s3626_s0, %s2147_s14  ;;  %s2760_s10 = scalar_lea.sflag [#allocation3], %s258_s12 }
  0x4c   : > { %s262_s23 = scalar_lea.vmem [#allocation2], %s2221_s19  ;;  %s2463_s15 = scalar_lea.hbm %s2756_s22, 1280 }
  0x4d   : > { %s269_s29 = sshll.u32 %s262_s23, 4  ;;  %p2464_p12 = scmp.ne.s32.totalorder %s2756_s22, %s2463_s15  ;;  %s2758_s29 = int_to_ptr.vmem [resolvable:$true] %s269_s29 }
  0x4e   : > { %p2465_p0 = pneg %p2749_p11  ;;  %s2468_s21 = scalar_lea.hbm %s3626_s0, 2560 }
  0x4f   : > { %p2469_p13 = scmp.lt.u32.totalorder %s2756_s22, %s3626_s0  ;;  %p2470_p6 = scmp.lt.u32.totalorder %s2468_s21, %s2463_s15 }
  0x50   : > { %p2466_p2 = pnand %p2465_p0, %p2464_p12  ;;  %p2472_p3 = scmp.lt.u32.totalorder %s2463_s15, %s2756_s22 }
  0x51   : > { %p2471_p10 = por %p2470_p6, %p2469_p13 }
  0x52   : > { %p2467_p1 = pneg %p2466_p2 }
  0x53   : > { %p2473_p5 = por %p2472_p3, %p2471_p10 }
  0x55   : > { %p2474_p9 = pnand %p2473_p5, %p2467_p1 }
  0x57   : > { %2477 = shalt.err (!%p2474_p9)
}
  0x58   : > { %s2478_s12 = scalar_lea.vmem %s2758_s29, 1280  ;;  %s2571_s19 = smov [#allocation2]  }
  0x59   : > { %p2479_p12 = scmp.ne.s32.totalorder %s2758_s29, %s2478_s12  ;;  %s2483_s23 = sshll.u32 %s2571_s19, 4  ;;  %s2484_s23 = int_to_ptr.vmem [resolvable:$false] %s2483_s23 }
  0x5a   : > { %s2485_s1 = scalar_lea.vmem %s2484_s23, 2560  ;;  %p2486_p4 = scmp.lt.s32.totalorder %s2758_s29, %s2484_s23 }
  0x5b   : > { %p2481_p2 = pnand %p2479_p12, %p2465_p0  ;;  %p2487_p13 = scmp.lt.s32.totalorder %s2485_s1, %s2478_s12 }
  0x5d   : > { %p2482_p7 = pneg %p2481_p2  ;;  %p2488_p6 = por %p2487_p13, %p2486_p4 }
  0x5f   : > { %p2489_p10 = pnand %p2488_p6, %p2482_p7 }
  0x61   : > { %2492 = shalt.err (!%p2489_p10)
}
  0x62   : > { %s2572_s15 = smov 64   ;;  %s2573_s16 = smov 4  }
  0x63   : > { %2286 = dma.hbm_to_vmem [thread:$0]  (!%p2749_p11), %s2756_s22, 1280, %s2758_s29, %s2760_s10, %s2572_s15, %s2572_s15, %s2573_s16  }
  0x64   : > { %281 = sbr.rel (%p2659_p8) target bundleno = 693 (0x2b5), region = 48  ;;  %s2791_s14 = sand.u32 (!%p2659_p8), 1, %s2555_s25  }
  0x65   : > { %s2222_s21 = smul.u32 (!%p2659_p8), 80, %s2791_s14  ;;  %s284_s11 = scalar_lea.sflag (!%p2659_p8), [#allocation3], %s2791_s14 }
  0x66   : > { %p3649_p4 = scmp.ne.s32.totalorder (!%p2659_p8), %s3641_s30, 0 }
  0x67   : > { %s2795_s12 = scalar_lea.vmem (!%p2659_p8), [#allocation2], %s2222_s21 }
  0x6b   : > { %2538 = dma.done.wait (%p3649_p4), %s284_s11, 1280  }
  0x6c   : > { %2540 = vsyncadd (%p3649_p4), %s284_s11, 4294966016  ;;  %p3650_p7 = scmp.eq.s32.totalorder %s2640_s28, 0 }
  0x6e   : > { %2542 = dma.done.wait (%p3650_p7), [#allocation6], 5120   ;;  %p3651_p8 = pmov %p3650_p7 }
  0x6f   : > { %v2574_v0 = vmov 0   ;;  %v2341_v1 = vld [vmem:[#allocation5 + $0x4] ss:$12 sps:$4 sm:$0xff]   ;;  %v2343_v2 = vld [vmem:[#allocation5 + $0x8] ss:$12 sps:$4 sm:$0xff]   ;;  %v815_v51 = vlaneseq  ;;  %s2223_s1 = smul.u32 320, %s2791_s14 }
  0x70   : > { %2544 = vsyncadd (%p3651_p8), [#allocation6], 4294962176  ;;  %601 = vmatprep.mubr.bf16.mxu0 %v2574_v0  ;;  %569 = vmatprep.subr.bf16.mxu0 %v2341_v1  ;;  %v2344_v3 = vld [vmem:[#allocation5] ss:$12 sps:$4 sm:$0xff]   ;;  %v2345_v4 = vld [vmem:[#allocation5 + $0x1c] ss:$12 sps:$4 sm:$0xff]  }
  0x71   : > { %2169 = vmatprep.subr.bf16.mxu1 %v2343_v2  ;;  %570 = vmatpush1.bf16.msra.mxu0 %v2344_v3  ;;  %v2347_v5 = vld [vmem:[#allocation5 + $0x20] ss:$12 sps:$4 sm:$0xff]   ;;  %v2348_v6 = vld [vmem:[#allocation5 + $0x18] ss:$12 sps:$4 sm:$0xff]   ;;  %v2352_v9 = vld [vmem:[#allocation5 + $0x30] ss:$12 sps:$4 sm:$0xff]  }
  0x72   : > { %2170 = vmatpush3.bf16.msra.mxu1 %v2343_v2  ;;  %571 = vmatprep.subr.bf16.mxu0 %v2345_v4  ;;  %v2349_v7 = vld [vmem:[#allocation5 + $0x34] ss:$12 sps:$4 sm:$0xff]   ;;  %v2351_v8 = vld [vmem:[#allocation5 + $0x38] ss:$12 sps:$4 sm:$0xff]   ;;  %v2355_v11 = vld [vmem:[#allocation5 + $0x50] ss:$12 sps:$4 sm:$0xff]  }
  0x73   : > { %2171 = vmatprep.subr.bf16.mxu1 %v2347_v5  ;;  %v2353_v10 = vld [vmem:[#allocation5 + $0x4c] ss:$12 sps:$4 sm:$0xff]   ;;  %v2356_v12 = vld [vmem:[#allocation5 + $0x48] ss:$12 sps:$4 sm:$0xff]   ;;  %v2357_v13 = vld [vmem:[#allocation5 + $0x64] ss:$12 sps:$4 sm:$0xff]  }
  0x74   : > { %v2359_v14 = vld [vmem:[#allocation5 + $0x68] ss:$12 sps:$4 sm:$0xff]   ;;  %v2360_v15 = vld [vmem:[#allocation5 + $0x60] ss:$12 sps:$4 sm:$0xff]   ;;  %v2364_v18 = vld [vmem:[#allocation5 + $0x78] ss:$12 sps:$4 sm:$0xff]  }
  0x75   : > { %572 = vmatpush1.bf16.msra.mxu0 %v2348_v6  ;;  %v2361_v16 = vld [vmem:[#allocation5 + $0x7c] ss:$12 sps:$4 sm:$0xff]   ;;  %v2363_v17 = vld [vmem:[#allocation5 + $0x80] ss:$12 sps:$4 sm:$0xff]   ;;  %v2367_v21 = vld [vmem:[#allocation5 + $0x98] ss:$12 sps:$4 sm:$0xff]  }
  0x76   : > { %2172 = vmatpush3.bf16.msra.mxu1 %v2347_v5  ;;  %573 = vmatprep.subr.bf16.mxu0 %v2349_v7  ;;  %v2373_v19 = vld [vmem:[%s2795_s12] sm:$0xff]   ;;  %v2369_v23 = vld [vmem:[#allocation5 + $0xac] ss:$12 sps:$4 sm:$0xff]   ;;  %v2375_v27 = vld [vmem:[%s2795_s12 + $0x10] sm:$0xff]   ;;  %v2827_v52 = vshrl.u32 %v815_v51, 7  ;;  %s3461_s15 = scalar_lea.vmem [#allocation8], %s2223_s1 }
  0x77   : > { %2173 = vmatprep.subr.bf16.mxu1 %v2351_v8  ;;  %v2365_v20 = vld [vmem:[#allocation5 + $0x94] ss:$12 sps:$4 sm:$0xff]   ;;  %2185 = vmatprep.mubr.bf16.mxu1 %v2373_v19  ;;  %v2368_v22 = vld [vmem:[#allocation5 + $0x90] ss:$12 sps:$4 sm:$0xff]   ;;  %v2385_v35 = vld [vmem:[#allocation7 + $0x4] ss:$8 sps:$4 sm:$0xff]  }
  0x78   : > { %v2371_v24 = vld [vmem:[#allocation5 + $0xb0] ss:$12 sps:$4 sm:$0xff]   ;;  %v2372_v25 = vld [vmem:[#allocation5 + $0xa8] ss:$12 sps:$4 sm:$0xff]   ;;  %v2391_v40 = vld [vmem:[#allocation7 + $0x24] ss:$8 sps:$4 sm:$0xff]  }
  0x79   : > { %574 = vmatpush1.bf16.msra.mxu0 %v2352_v9  ;;  %v2374_v26 = vld [vmem:[%s2795_s12 + $0x8] sm:$0xff]   ;;  %v2376_v28 = vld [vmem:[%s2795_s12 + $0x18] sm:$0xff]   ;;  %v2377_v29 = vld [vmem:[%s2795_s12 + $0x20] sm:$0xff]   ;;  %v817_v53 = vadd.s32 8, %v2827_v52  ;;  %v818_v56 = vadd.s32 16, %v2827_v52  ;;  %v819_v57 = vadd.s32 24, %v2827_v52 }
  0x7a   : > { %2174 = vmatpush3.bf16.msra.mxu1 %v2351_v8  ;;  %575 = vmatprep.subr.bf16.mxu0 %v2353_v10  ;;  %v2378_v30 = vld [vmem:[%s2795_s12 + $0x28] sm:$0xff]   ;;  %v2379_v31 = vld [vmem:[%s2795_s12 + $0x30] sm:$0xff]   ;;  %v2380_v32 = vld [vmem:[%s2795_s12 + $0x38] sm:$0xff]   ;;  %v820_v58 = vadd.s32 32, %v2827_v52  ;;  %v821_v63 = vadd.s32 40, %v2827_v52  ;;  %s2150_s16 = smul.u32 5120, %s2640_s28 }
  0x7b   : > { %2175 = vmatprep.subr.bf16.mxu1 %v2355_v11  ;;  %v2381_v33 = vld [vmem:[%s2795_s12 + $0x40] sm:$0xff]   ;;  %v2382_v34 = vld [vmem:[%s2795_s12 + $0x48] sm:$0xff]   ;;  %v2830_v54 = vmul.u32.u64.low 3435973837, %v817_v53  ;;  %v2831_v55 = vmul.u32.u64.high 3435973837, %v817_v53, %v2830_v54  ;;  %v2836_v59 = vmul.u32.u64.low 3435973837, %v818_v56  ;;  %v2837_v60 = vmul.u32.u64.high 3435973837, %v818_v56, %v2836_v59 }
  0x7c   : > { %v2383_v36 = vld [vmem:[#allocation7] ss:$8 sps:$4 sm:$0xff]   ;;  %v2388_v37 = vld [vmem:[#allocation7 + $0x14] ss:$8 sps:$4 sm:$0xff]   ;;  %v2386_v38 = vld [vmem:[#allocation7 + $0x10] ss:$8 sps:$4 sm:$0xff]   ;;  %s3577_s30 = scalar_lea.hbm %s3633_s7, %s2150_s16 }
  0x7d   : > { %576 = vmatpush1.bf16.msra.mxu0 %v2356_v12  ;;  %v2389_v39 = vld [vmem:[#allocation7 + $0x20] ss:$8 sps:$4 sm:$0xff]   ;;  %v2394_v41 = vld [vmem:[#allocation7 + $0x34] ss:$8 sps:$4 sm:$0xff]   ;;  %v2392_v42 = vld [vmem:[#allocation7 + $0x30] ss:$8 sps:$4 sm:$0xff]  }
  0x7e   : > { %2176 = vmatpush3.bf16.msra.mxu1 %v2355_v11  ;;  %577 = vmatprep.subr.bf16.mxu0 %v2357_v13  ;;  %v2397_v43 = vld [vmem:[#allocation7 + $0x44] ss:$8 sps:$4 sm:$0xff]   ;;  %v2395_v44 = vld [vmem:[#allocation7 + $0x40] ss:$8 sps:$4 sm:$0xff]   ;;  %v2400_v45 = vld [vmem:[#allocation7 + $0x54] ss:$8 sps:$4 sm:$0xff]  }
  0x7f   : > { %2177 = vmatprep.subr.bf16.mxu1 %v2359_v14  ;;  %v2398_v46 = vld [vmem:[#allocation7 + $0x50] ss:$8 sps:$4 sm:$0xff]   ;;  %v2403_v47 = vld [vmem:[#allocation7 + $0x64] ss:$8 sps:$4 sm:$0xff]   ;;  %v2401_v48 = vld [vmem:[#allocation7 + $0x60] ss:$8 sps:$4 sm:$0xff]  }
  0x80   : > { %v2406_v49 = vld [vmem:[#allocation7 + $0x74] ss:$8 sps:$4 sm:$0xff]   ;;  %v2404_v50 = vld [vmem:[#allocation7 + $0x70] ss:$8 sps:$4 sm:$0xff]   ;;  %v2839_v61 = vmul.u32.u64.low 3435973837, %v819_v57  ;;  %v2840_v62 = vmul.u32.u64.high 3435973837, %v819_v57, %v2839_v61 }
  0x81   : > { %578 = vmatpush1.bf16.msra.mxu0 %v2360_v15  ;;  %v853_v1 = vshrl.u32 %v2831_v55, 4  ;;  %v2844_v2 = vmul.u32.u64.low 3435973837, %v820_v58  ;;  %v2845_v3 = vmul.u32.u64.high 3435973837, %v820_v58, %v2844_v2  ;;  %v864_v9 = vshrl.u32 %v2837_v60, 4  ;;  %s1950_s21 = sshll.u32 %s3461_s15, 4  ;;  %s1936_s28 = scalar_lea.sflag [#allocation4], %s2791_s14  ;;  %s3580_s21 = int_to_ptr.vmem [resolvable:$true] %s1950_s21 }
  0x82   : > { %2178 = vmatpush3.bf16.msra.mxu1 %v2359_v14  ;;  %579 = vmatprep.subr.bf16.mxu0 %v2361_v16  ;;  %v2847_v4 = vmul.u32.u64.low 3435973837, %v821_v63  ;;  %v2848_v5 = vmul.u32.u64.high 3435973837, %v821_v63, %v2847_v4  ;;  %v2851_v7 = vmul.u32.u64.low 3435973837, %v2827_v52  ;;  %v2852_v8 = vmul.u32.u64.high 3435973837, %v2827_v52, %v2851_v7  ;;  %s2493_s9 = scalar_lea.vmem %s3580_s21, 5120  ;;  %p3661_p0 = scmp.ne.s32.totalorder %s3647_s18, 0 }
  0x83   : > { %2179 = vmatprep.subr.bf16.mxu1 %v2363_v17  ;;  %v854_v6 = vmul.u32 20, %v853_v1  ;;  %v875_v10 = vshrl.u32 %v2840_v62, 4  ;;  %v886_v12 = vshrl.u32 %v2845_v3, 4  ;;  %v865_v13 = vmul.u32 20, %v864_v9  ;;  %p2494_p11 = scmp.ne.s32.totalorder %s3580_s21, %s2493_s9  ;;  %s2576_s20 = smov [#allocation8]  }
  0x84   : > { %v2858_v14 = vadd.s32 48, %v2827_v52  ;;  %v2861_v16 = vadd.s32 56, %v2827_v52  ;;  %v3638_v61 = vmov 0.0   ;;  %s2497_s22 = sshll.u32 %s2576_s20, 4  ;;  %s2498_s22 = int_to_ptr.vmem [resolvable:$false] %s2497_s22 }
  0x85   : > { %580 = vmatpush1.bf16.msra.mxu0 %v2364_v18  ;;  %v855_v11 = vsub.s32 %v817_v53, %v854_v6  ;;  %v876_v15 = vmul.u32 20, %v875_v10  ;;  %v2865_v18 = vadd.s32 64, %v2827_v52  ;;  %p2495_p1 = pnand %p2494_p11, %p3661_p0  ;;  %s2499_s29 = scalar_lea.vmem %s2498_s22, 10240 }
  0x86   : > { %2180 = vmatpush3.bf16.msra.mxu1 %v2363_v17  ;;  %581 = vmatprep.subr.bf16.mxu0 %v2365_v20  ;;  %v897_v17 = vshrl.u32 %v2848_v5, 4  ;;  %v2868_v20 = vadd.s32 72, %v2827_v52  ;;  %p2500_p5 = scmp.lt.s32.totalorder %s3580_s21, %s2498_s22  ;;  %p2501_p9 = scmp.lt.s32.totalorder %s2499_s29, %s2493_s9 }
  0x87   : > { %2181 = vmatprep.subr.bf16.mxu1 %v2367_v21  ;;  %vm1057_vm0 = vcmp.ne.s32.totalorder %v855_v11, 0  ;;  %vm1077_vm1 = vcmp.lt.s32.totalorder %v855_v11, 0  ;;  %p2496_p3 = pneg %p2495_p1 }
  0x88   : > { %vm1097_vm2 = vmand %vm1077_vm1, %vm1057_vm0  ;;  %p2502_p12 = por %p2501_p9, %p2500_p5 }
  0x89   : > { %582 = vmatpush1.bf16.msra.mxu0 %v2368_v22  ;;  %v866_v22 = vsub.s32 %v818_v56, %v865_v13 }
  0x8a   : > { %2182 = vmatpush3.bf16.msra.mxu1 %v2367_v21  ;;  %583 = vmatprep.subr.bf16.mxu0 %v2369_v23  ;;  %v842_v21 = vshrl.u32 %v2852_v8, 4  ;;  %p2503_p2 = pnand %p2502_p12, %p2496_p3 }
  0x8b   : > { %2183 = vmatprep.subr.bf16.mxu1 %v2371_v24  ;;  %vm1058_vm3 = vcmp.ne.s32.totalorder %v866_v22, 0  ;;  %vm1078_vm4 = vcmp.lt.s32.totalorder %v866_v22, 0 }
  0x8c   : > { %vm1098_vm7 = vmand %vm1078_vm4, %vm1058_vm3 }
  0x8d   : > { %584 = vmatpush1.bf16.msra.mxu0 %v2372_v25  ;;  %v1117_v25 = vadd.s32 20, %v855_v11 }
  0x8e   : > { %2184 = vmatpush3.bf16.msra.mxu1 %v2371_v24  ;;  %1618 = vmatprep.subr.bf16.mxu0 %v2385_v35  ;;  %v2872_v23 = vmul.u32.u64.low 3435973837, %v2858_v14  ;;  %v2873_v24 = vmul.u32.u64.high 3435973837, %v2858_v14, %v2872_v23 }
  0x8f   : > { %2205 = vmatprep.subr.bf16.mxu1 %v2385_v35  ;;  %v2888_v35 = vadd.s32 80, %v2827_v52 }
  0x90   : > { %602 = vmatmul.mubr.bf16.vlgmr.msra.gmra.mrb[0].mxu0 %v2373_v19  ;;  %v887_v19 = vmul.u32 20, %v886_v12 }
  0x91   : > { %2186 = vmatmul.mubr.bf16.vlgmr.msra.gmra.mrb[0].mxu1 %v2374_v26  ;;  %611 = vmatprep.mubr.bf16.mxu0 %v2574_v0 }
  0x92   : > { %2189 = vmatprep.mubr.bf16.mxu1 %v2375_v27  ;;  %2213 = vmatpush1.bf16.msra.mxu1 %v2383_v36 }
  0x93   : > { %1619 = vmatpush1.bf16.msra.mxu0 %v2383_v36  ;;  %2206 = vmatprep.subr.bf16.mxu1 %v2388_v37  ;;  %v843_v36 = vmul.u32 20, %v842_v21 }
  0x94   : > { %1620 = vmatprep.subr.bf16.mxu0 %v2388_v37  ;;  %v1137_v37 = vsel %vm1097_vm2, %v1117_v25, %v855_v11  ;;  %v2957_v25 = vadd.s32 104, %v2827_v52 }
  0x95   : > { %vm1157_vm11 = vcmp.ne.s32.totalorder %v1137_v37, 0  ;;  %vm1217_vm15 = vcmp.ne.s32.totalorder %v1137_v37, 19 }
  0x96   : > { %2214 = vmatpush1.bf16.msra.mxu1 %v2386_v38  ;;  %v2909_v62 = vsel %vm1157_vm11, 1.0, %v3638_v61  ;;  %v2915_v2 = vsel %vm1217_vm15, 1.0, %v3638_v61 }
  0x97   : > { %1621 = vmatpush1.bf16.msra.mxu0 %v2386_v38  ;;  %2207 = vmatprep.subr.bf16.mxu1 %v2391_v40  ;;  %v1118_v38 = vadd.s32 20, %v866_v22 }
  0x98   : > { %612 = vmatmul.mubr.bf16.gmra.mrb[4].mxu0 %v2374_v26  ;;  %1622 = vmatprep.subr.bf16.mxu0 %v2391_v40  ;;  %v877_v26 = vsub.s32 %v819_v57, %v876_v15 }
  0x99   : > { %2190 = vmatmul.mubr.bf16.gmra.mrb[4].mxu1 %v2376_v28  ;;  %621 = vmatprep.mubr.bf16.mxu0 %v2574_v0 }
  0x9a   : > { %2193 = vmatprep.mubr.bf16.mxu1 %v2377_v29  ;;  %2215 = vmatpush1.bf16.msra.mxu1 %v2389_v39  ;;  %vm1059_vm5 = vcmp.ne.s32.totalorder %v877_v26, 0  ;;  %vm1079_vm6 = vcmp.lt.s32.totalorder %v877_v26, 0 }
  0x9b   : > { %1623 = vmatpush1.bf16.msra.mxu0 %v2389_v39  ;;  %2208 = vmatprep.subr.bf16.mxu1 %v2394_v41  ;;  %v1119_v39 = vadd.s32 20, %v877_v26  ;;  %vm1099_vm10 = vmand %vm1079_vm6, %vm1059_vm5 }
  0x9c   : > { %1624 = vmatprep.subr.bf16.mxu0 %v2394_v41  ;;  %v2891_v41 = vadd.s32 88, %v2827_v52 }
  0x9d   : > { %v1139_v53 = vsel %vm1099_vm10, %v1119_v39, %v877_v26  ;;  %v2980_v39 = vadd.s32 120, %v2827_v52 }
  0x9e   : > { %2216 = vmatpush1.bf16.msra.mxu1 %v2392_v42  ;;  %vm1159_vm4 = vcmp.ne.s32.totalorder %v1139_v53, 0 }
  0x9f   : > { %1625 = vmatpush1.bf16.msra.mxu0 %v2392_v42  ;;  %2209 = vmatprep.subr.bf16.mxu1 %v2397_v43  ;;  %v2926_v6 = vsel %vm1159_vm4, 1.0, %v3638_v61 }
  0xa0   : > { %622 = vmatmul.mubr.bf16.gmra.mrb[8].mxu0 %v2375_v27  ;;  %1626 = vmatprep.subr.bf16.mxu0 %v2397_v43  ;;  %v2894_v42 = vmul.u32.u64.low 3435973837, %v2888_v35  ;;  %v2895_v43 = vmul.u32.u64.high 3435973837, %v2888_v35, %v2894_v42 }
  0xa1   : > { %2194 = vmatmul.mubr.bf16.gmra.mrb[8].mxu1 %v2378_v30  ;;  %631 = vmatprep.mubr.bf16.mxu0 %v2574_v0 }
  0xa2   : > { %2197 = vmatprep.mubr.bf16.mxu1 %v2379_v31  ;;  %2217 = vmatpush1.bf16.msra.mxu1 %v2395_v44  ;;  %v952_v1 = vshrl.u32 %v2895_v43, 4 }
  0xa3   : > { %1627 = vmatpush1.bf16.msra.mxu0 %v2395_v44  ;;  %2210 = vmatprep.subr.bf16.mxu1 %v2400_v45  ;;  %v844_v44 = vsub.s32 %v2827_v52, %v843_v36 }
  0xa4   : > { %1628 = vmatprep.subr.bf16.mxu0 %v2400_v45  ;;  %v908_v45 = vshrl.u32 %v2873_v24, 4  ;;  %v953_v15 = vmul.u32 20, %v952_v1 }
  0xa5   : > { %vm1056_vm0 = vcmp.ne.s32.totalorder %v844_v44, 0  ;;  %vm1076_vm1 = vcmp.lt.s32.totalorder %v844_v44, 0  ;;  %v1116_v59 = vadd.s32 20, %v844_v44 }
  0xa6   : > { %2218 = vmatpush1.bf16.msra.mxu1 %v2398_v46  ;;  %v909_v55 = vmul.u32 20, %v908_v45  ;;  %vm1096_vm6 = vmand %vm1076_vm1, %vm1056_vm0 }
  0xa7   : > { %1629 = vmatpush1.bf16.msra.mxu0 %v2398_v46  ;;  %2211 = vmatprep.subr.bf16.mxu1 %v2403_v47  ;;  %v2929_v9 = vsel %vm1096_vm6, %v1116_v59, %v844_v44 }
  0xa8   : > { %632 = vmatmul.mubr.bf16.gmra.mrb[12].mxu0 %v2376_v28  ;;  %1630 = vmatprep.subr.bf16.mxu0 %v2403_v47  ;;  %v2876_v27 = vmul.u32.u64.low 3435973837, %v2861_v16  ;;  %v2877_v28 = vmul.u32.u64.high 3435973837, %v2861_v16, %v2876_v27  ;;  %v910_v4 = vsub.s32 %v2858_v14, %v909_v55 }
  0xa9   : > { %2198 = vmatmul.mubr.bf16.gmra.mrb[12].mxu1 %v2380_v32  ;;  %641 = vmatprep.mubr.bf16.mxu0 %v2574_v0 }
  0xaa   : > { %2201 = vmatprep.mubr.bf16.mxu1 %v2381_v33  ;;  %2219 = vmatpush1.bf16.msra.mxu1 %v2401_v48  ;;  %v919_v47 = vshrl.u32 %v2877_v28, 4 }
  0xab   : > { %1631 = vmatpush1.bf16.msra.mxu0 %v2401_v48  ;;  %2212 = vmatprep.subr.bf16.mxu1 %v2406_v49  ;;  %v1138_v48 = vsel %vm1098_vm7, %v1118_v38, %v866_v22  ;;  %vm1219_vm7 = vcmp.ne.s32.totalorder %v1139_v53, 19  ;;  %v2976_v37 = vmul.u32.u64.low 3435973837, %v2957_v25  ;;  %v2977_v38 = vmul.u32.u64.high 3435973837, %v2957_v25, %v2976_v37 }
  0xac   : > { %1632 = vmatprep.subr.bf16.mxu0 %v2406_v49  ;;  %vm1158_vm2 = vcmp.ne.s32.totalorder %v1138_v48, 0  ;;  %vm1218_vm3 = vcmp.ne.s32.totalorder %v1138_v48, 19  ;;  %v2932_v10 = vsel %vm1219_vm7, 1.0, %v3638_v61 }
  0xad   : > { %v2919_v3 = vsel %vm1158_vm2, 1.0, %v3638_v61  ;;  %v2923_v5 = vsel %vm1218_vm3, 1.0, %v3638_v61 }
  0xae   : > { %2220 = vmatpush1.bf16.msra.mxu1 %v2404_v50 }
  0xaf   : > { %1633 = vmatpush1.bf16.msra.mxu0 %v2404_v50  ;;  %v2902_v50 = vmul.u32.u64.low 3435973837, %v2891_v41  ;;  %v2903_v51 = vmul.u32.u64.high 3435973837, %v2891_v41, %v2902_v50 }
  0xb0   : > { %642 = vmatmul.mubr.bf16.gmra.mrb[16].mxu0 %v2377_v29  ;;  %v898_v29 = vmul.u32 20, %v897_v17  ;;  %v2944_v17 = vadd.s32 152, %v2827_v52 }
  0xb1   : > { %2202 = vmatmul.mubr.bf16.gmra.mrb[16].mxu1 %v2382_v34  ;;  %651 = vmatprep.mubr.bf16.mxu0 %v2574_v0  ;;  %v963_v12 = vshrl.u32 %v2903_v51, 4 }
  0xb2   : > { %1670 = vmatprep.mubr.bf16.mxu1 %v2574_v0  ;;  %v899_v40 = vsub.s32 %v821_v63, %v898_v29 }
  0xb4   : > { %vm1061_vm13 = vcmp.ne.s32.totalorder %v899_v40, 0  ;;  %vm1081_vm14 = vcmp.lt.s32.totalorder %v899_v40, 0  ;;  %v1121_v57 = vadd.s32 20, %v899_v40 }
  0xb5   : > { %vm1101_vm5 = vmand %vm1081_vm14, %vm1061_vm13  ;;  %vm1082_vm13 = vcmp.lt.s32.totalorder %v910_v4, 0 }
  0xb6   : > { %v1141_v7 = vsel %vm1101_vm5, %v1121_v57, %v899_v40 }
  0xb7   : > { %vm1161_vm10 = vcmp.ne.s32.totalorder %v1141_v7, 0  ;;  %vm1221_vm11 = vcmp.ne.s32.totalorder %v1141_v7, 19 }
  0xb8   : > { %652 = vmatmul.mubr.bf16.gmra.mrb[20].mxu0 %v2378_v30  ;;  %v2953_v23 = vsel %vm1161_vm10, 1.0, %v3638_v61  ;;  %v2961_v26 = vsel %vm1221_vm11, 1.0, %v3638_v61  ;;  %vm1296_vm10 = vcmp.lt.s32.totalorder %v2827_v52, 1 }
  0xb9   : > { %661 = vmatprep.mubr.bf16.mxu0 %v2574_v0 }
  0xc0   : > { %662 = vmatmul.mubr.bf16.gmra.mrb[24].mxu0 %v2379_v31  ;;  %v2880_v30 = vmul.u32.u64.low 3435973837, %v2865_v18  ;;  %v2881_v31 = vmul.u32.u64.high 3435973837, %v2865_v18, %v2880_v30 }
  0xc1   : > { %671 = vmatprep.mubr.bf16.mxu0 %v2574_v0 }
  0xc2   : > { %v930_v49 = vshrl.u32 %v2881_v31, 4 }
  0xc4   : > { %v931_v60 = vmul.u32 20, %v930_v49 }
  0xc6   : > { %v932_v11 = vsub.s32 %v2865_v18, %v931_v60  ;;  %v1122_v18 = vadd.s32 20, %v910_v4 }
  0xc8   : > { %672 = vmatmul.mubr.bf16.gmra.mrb[28].mxu0 %v2380_v32  ;;  %v888_v32 = vsub.s32 %v820_v58, %v887_v19  ;;  %v920_v58 = vmul.u32 20, %v919_v47  ;;  %vm1064_vm0 = vcmp.ne.s32.totalorder %v932_v11, 0  ;;  %vm1084_vm1 = vcmp.lt.s32.totalorder %v932_v11, 0 }
  0xc9   : > { %681 = vmatprep.mubr.bf16.mxu0 %v2574_v0  ;;  %v964_v19 = vmul.u32 20, %v963_v12  ;;  %v1124_v24 = vadd.s32 20, %v932_v11  ;;  %vm1104_vm6 = vmand %vm1084_vm1, %vm1064_vm0 }
  0xca   : > { %vm1060_vm8 = vcmp.ne.s32.totalorder %v888_v32, 0  ;;  %vm1080_vm9 = vcmp.lt.s32.totalorder %v888_v32, 0  ;;  %v1120_v46 = vadd.s32 20, %v888_v32  ;;  %v921_v8 = vsub.s32 %v2861_v16, %v920_v58 }
  0xcb   : > { %vm1100_vm12 = vmand %vm1080_vm9, %vm1060_vm8  ;;  %v2941_v16 = vadd.s32 96, %v2827_v52  ;;  %v965_v31 = vsub.s32 %v2891_v41, %v964_v19  ;;  %v1144_v36 = vsel %vm1104_vm6, %v1124_v24, %v932_v11 }
  0xcc   : > { %v1140_v56 = vsel %vm1100_vm12, %v1120_v46, %v888_v32  ;;  %vm1062_vm12 = vcmp.ne.s32.totalorder %v910_v4, 0  ;;  %vm1063_vm14 = vcmp.ne.s32.totalorder %v921_v8, 0  ;;  %vm1083_vm15 = vcmp.lt.s32.totalorder %v921_v8, 0 }
  0xcd   : > { %vm1160_vm8 = vcmp.ne.s32.totalorder %v1140_v56, 0  ;;  %vm1220_vm9 = vcmp.ne.s32.totalorder %v1140_v56, 19  ;;  %vm1102_vm2 = vmand %vm1082_vm13, %vm1062_vm12  ;;  %v1123_v21 = vadd.s32 20, %v921_v8  ;;  %vm1377_vm13 = vcmp.lt.s32.totalorder %v2827_v52, 7 }
  0xce   : > { %v2937_v13 = vsel %vm1160_vm8, 1.0, %v3638_v61  ;;  %v2949_v22 = vsel %vm1220_vm9, 1.0, %v3638_v61  ;;  %vm1103_vm5 = vmand %vm1083_vm15, %vm1063_vm14  ;;  %v2964_v28 = vmul.u32.u64.low 3435973837, %v2941_v16  ;;  %v2965_v29 = vmul.u32.u64.high 3435973837, %v2941_v16, %v2964_v28 }
  0xcf   : > { %v1142_v30 = vsel %vm1102_vm2, %v1122_v18, %v910_v4  ;;  %vm1067_vm1 = vcmp.ne.s32.totalorder %v965_v31, 0  ;;  %vm1087_vm2 = vcmp.lt.s32.totalorder %v965_v31, 0  ;;  %v1127_v44 = vadd.s32 20, %v965_v31 }
  0xd0   : > { %682 = vmatmul.mubr.bf16.gmra.mrb[32].mxu0 %v2381_v33  ;;  %vm1162_vm11 = vcmp.ne.s32.totalorder %v1142_v30, 0  ;;  %vm1222_vm12 = vcmp.ne.s32.totalorder %v1142_v30, 19  ;;  %v2990_v45 = vmul.u32.u64.low 3435973837, %v2980_v39  ;;  %v2991_v46 = vmul.u32.u64.high 3435973837, %v2980_v39, %v2990_v45 }
  0xd1   : > { %691 = vmatprep.mubr.bf16.mxu0 %v2574_v0  ;;  %v2995_v47 = vsel %vm1162_vm11, 1.0, %v3638_v61  ;;  %v974_v50 = vshrl.u32 %v2965_v29, 4  ;;  %v3004_v51 = vsel %vm1222_vm12, 1.0, %v3638_v61 }
  0xd3   : > { %v975_v19 = vmul.u32 20, %v974_v50 }
  0xd8   : > { %692 = vmatmul.mubr.bf16.gmra.mrb[36].mxu0 %v2382_v34  ;;  %v2884_v33 = vmul.u32.u64.low 3435973837, %v2868_v20  ;;  %v2885_v34 = vmul.u32.u64.high 3435973837, %v2868_v20, %v2884_v33 }
  0xd9   : > { %1650 = vmatprep.mubr.bf16.mxu0 %v2574_v0  ;;  %v2969_v32 = vmul.u32.u64.low 3435973837, %v2944_v17  ;;  %v2970_v33 = vmul.u32.u64.high 3435973837, %v2944_v17, %v2969_v32 }
  0xda   : > { %v941_v54 = vshrl.u32 %v2885_v34, 4  ;;  %v1143_v34 = vsel %vm1103_vm5, %v1123_v21, %v921_v8  ;;  %v985_v8 = vshrl.u32 %v2977_v38, 4 }
  0xdb   : > { %vm1163_vm14 = vcmp.ne.s32.totalorder %v1143_v34, 0  ;;  %vm1223_vm15 = vcmp.ne.s32.totalorder %v1143_v34, 19 }
  0xdc   : > { %v942_v63 = vmul.u32 20, %v941_v54  ;;  %v3008_v53 = vsel %vm1163_vm14, 1.0, %v3638_v61  ;;  %v1051_v54 = vshrl.u32 %v2970_v33, 4  ;;  %v3015_v57 = vsel %vm1223_vm15, 1.0, %v3638_v61 }
  0xdd   : > { %v986_v34 = vmul.u32 20, %v985_v8 }
  0xde   : > { %v943_v14 = vsub.s32 %v2868_v20, %v942_v63  ;;  %v954_v20 = vsub.s32 %v2888_v35, %v953_v15  ;;  %v2973_v35 = vadd.s32 112, %v2827_v52  ;;  %v1052_v29 = vmul.u32 20, %v1051_v54 }
  0xdf   : > { %v3083_v8 = vsub.s32 %v2957_v25, %v986_v34 }
  0xe0   : > { %vm1065_vm3 = vcmp.ne.s32.totalorder %v943_v14, 0  ;;  %vm1085_vm4 = vcmp.lt.s32.totalorder %v943_v14, 0  ;;  %v1125_v27 = vadd.s32 20, %v943_v14  ;;  %vm1066_vm8 = vcmp.ne.s32.totalorder %v954_v20, 0 }
  0xe1   : > { %vm1105_vm7 = vmand %vm1085_vm4, %vm1065_vm3  ;;  %vm1086_vm9 = vcmp.lt.s32.totalorder %v954_v20, 0  ;;  %v1126_v41 = vadd.s32 20, %v954_v20  ;;  %vm1164_vm3 = vcmp.ne.s32.totalorder %v1144_v36, 0  ;;  %vm1224_vm4 = vcmp.ne.s32.totalorder %v1144_v36, 19 }
  0xe2   : > { %v1145_v40 = vsel %vm1105_vm7, %v1125_v27, %v943_v14  ;;  %vm1106_vm0 = vmand %vm1086_vm9, %vm1066_vm8  ;;  %v2986_v42 = vmul.u32.u64.low 3435973837, %v2973_v35  ;;  %v2987_v43 = vmul.u32.u64.high 3435973837, %v2973_v35, %v2986_v42  ;;  %v3019_v58 = vsel %vm1164_vm3, 1.0, %v3638_v61 }
  0xe3   : > { %vm1165_vm5 = vcmp.ne.s32.totalorder %v1145_v40, 0  ;;  %vm1225_vm6 = vcmp.ne.s32.totalorder %v1145_v40, 19  ;;  %v1146_v48 = vsel %vm1106_vm0, %v1126_v41, %v954_v20  ;;  %vm2997_vm7 = vmand %vm1087_vm2, %vm1067_vm1  ;;  %v3023_v59 = vsel %vm1224_vm4, 1.0, %v3638_v61 }
  0xe4   : > { %vm1166_vm8 = vcmp.ne.s32.totalorder %v1146_v48, 0  ;;  %v3027_v60 = vsel %vm1165_vm5, 1.0, %v3638_v61  ;;  %v3035_v4 = vsel %vm1225_vm6, 1.0, %v3638_v61  ;;  %vm1226_vm9 = vcmp.ne.s32.totalorder %v1146_v48, 19 }
  0xe5   : > { %v1147_v7 = vsel %vm2997_vm7, %v1127_v44, %v965_v31  ;;  %v3043_v18 = vsel %vm1166_vm8, 1.0, %v3638_v61  ;;  %v996_v31 = vshrl.u32 %v2987_v43, 4  ;;  %v1007_v36 = vshrl.u32 %v2991_v46, 4 }
  0xe6   : > { %vm1167_vm11 = vcmp.ne.s32.totalorder %v1147_v7, 0  ;;  %vm1227_vm12 = vcmp.ne.s32.totalorder %v1147_v7, 19  ;;  %v976_v41 = vsub.s32 %v2941_v16, %v975_v19  ;;  %v3067_v43 = vsel %vm1226_vm9, 1.0, %v3638_v61 }
  0xe7   : > { %v3070_v44 = vsel %vm1167_vm11, 1.0, %v3638_v61  ;;  %v3077_v50 = vsel %vm1227_vm12, 1.0, %v3638_v61  ;;  %v997_v16 = vmul.u32 20, %v996_v31  ;;  %vm1069_vm1 = vcmp.ne.s32.totalorder %v3083_v8, 0 }
  0xe8   : > { %vm1068_vm14 = vcmp.ne.s32.totalorder %v976_v41, 0  ;;  %vm1088_vm15 = vcmp.lt.s32.totalorder %v976_v41, 0  ;;  %vm1089_vm2 = vcmp.lt.s32.totalorder %v3083_v8, 0 }
  0xe9   : > { %vm1108_vm0 = vmand %vm1088_vm15, %vm1068_vm14 }
  0xea   : > { %vm1109_vm3 = vmand %vm1089_vm2, %vm1069_vm1 }
 0x163   : > { %v3011_v55 = vpop.f32.mrb[0].mxu0 }
 0x164   : > { %v2187_v56 = vpop.f32.mrb[0].mxu1  ;;  %v3029_v63 = vpop.f32.mrb[1].mxu0  ;;  %v3637_v21 = vrot.slane %v3011_v55, 7 }
 0x165   : > { %v3031_v1 = vpop.f32.mrb[1].mxu1  ;;  %v1359_v11 = vrot.slane %v2187_v56, 1  ;;  %v607_v12 = vpop.f32.mrb[2].mxu0 }
 0x166   : > { %v1357_v14 = vrot.slane %v3031_v1, 1  ;;  %v2188_v15 = vpop.f32.mrb[2].mxu1  ;;  %v1277_v20 = vrot.slane %v607_v12, 7  ;;  %v609_v24 = vpop.f32.mrb[3].mxu0 }
 0x167   : > { %v1360_v27 = vrot.slane %v2188_v15, 1  ;;  %v739_v28 = vpop.f32.mrb[3].mxu1 }
 0x168   : > { %v1358_v30 = vrot.slane %v739_v28, 1  ;;  %v1315_v32 = vsel %vm1296_vm10, %v3637_v21, %v1277_v20 }
 0x169   : > { %v1394_v33 = vsel %vm1377_vm13, %v1359_v11, %v1360_v27  ;;  %v1318_v37 = vmul.f32 %v2909_v62, %v1315_v32  ;;  %v3073_v62 = vsub.s32 %v2944_v17, %v1052_v29  ;;  %v3088_v17 = vadd.s32 136, %v2827_v52 }
 0x16a   : > { %v1395_v38 = vsel %vm1377_vm13, %v1358_v30, %v1359_v11  ;;  %v3061_v40 = vsel %vm1377_vm13, %v1357_v14, %v1358_v30  ;;  %v3085_v11 = vmul.u32 20, %v1007_v36  ;;  %v1400_v34 = vmul.f32 %v2923_v5, %v1394_v33 }
 0x16b   : > { %v1399_v42 = vmul.f32 %v2915_v2, %v1395_v38  ;;  %v1338_v45 = vadd.f32 %v1318_v37, %v609_v24  ;;  %v613_v46 = vpop.f32.mrb[4].mxu0  ;;  %v3080_v2 = vadd.s32 128, %v2827_v52 }
 0x16c   : > { %v2191_v49 = vpop.f32.mrb[4].mxu1  ;;  %v1278_v48 = vrot.slane %v613_v46, 7  ;;  %v615_v54 = vpop.f32.mrb[5].mxu0 }
 0x16d   : > { %v752_v56 = vpop.f32.mrb[5].mxu1  ;;  %v3090_v12 = vadd.f32 %v1399_v42, %v1338_v45  ;;  %v617_v7 = vpop.f32.mrb[6].mxu0  ;;  %v1363_v15 = vrot.slane %v2191_v49, 1  ;;  %v3105_v45 = vsub.s32 %v2973_v35, %v997_v16  ;;  %v3119_v35 = vadd.s32 144, %v2827_v52 }
 0x16e   : > { %v1361_v19 = vrot.slane %v752_v56, 1  ;;  %v2192_v24 = vpop.f32.mrb[6].mxu1  ;;  %v1314_v28 = vsel %vm1296_vm10, %v1277_v20, %v1278_v48  ;;  %v1279_v29 = vrot.slane %v617_v7, 7  ;;  %v619_v30 = vpop.f32.mrb[7].mxu0  ;;  %v1128_v20 = vadd.s32 20, %v976_v41 }
 0x16f   : > { %v1364_v31 = vrot.slane %v2192_v24, 1  ;;  %v755_v25 = vpop.f32.mrb[7].mxu1  ;;  %v1319_v32 = vmul.f32 %v2919_v3, %v1314_v28  ;;  %vm1070_vm6 = vcmp.ne.s32.totalorder %v3105_v45, 0  ;;  %vm1090_vm7 = vcmp.lt.s32.totalorder %v3105_v45, 0 }
 0x170   : > { %v1393_v36 = vsel %vm1377_vm13, %v1360_v27, %v1361_v19  ;;  %v1362_v37 = vrot.slane %v755_v25, 1  ;;  %v1313_v38 = vsel %vm1296_vm10, %v1278_v48, %v1279_v29  ;;  %v3128_v28 = vsel %vm1108_vm0, %v1128_v20, %v976_v41  ;;  %vm3267_vm11 = vmand %vm1090_vm7, %vm1070_vm6 }
 0x171   : > { %v3102_v42 = vsel %vm1377_vm13, %v1363_v15, %v1364_v31  ;;  %v1339_v46 = vadd.f32 %v1319_v32, %v615_v54  ;;  %v1320_v3 = vmul.f32 %v2926_v6, %v1313_v38  ;;  %v1401_v5 = vmul.f32 %v2932_v10, %v1393_v36  ;;  %v3124_v6 = vld [vmem:[%s3628_s2] ss:$0 sm:$0xff] }
 0x172   : > { %v1391_v27 = vsel %vm1377_vm13, %v1362_v37, %v1363_v15  ;;  %v1392_v33 = vsel %vm1377_vm13, %v1361_v19, %v1362_v37  ;;  %v3115_v49 = vmul.u32.u64.low 3435973837, %v3080_v2  ;;  %v3116_v48 = vmul.u32.u64.high 3435973837, %v3080_v2, %v3115_v49 }
 0x173   : > { %v1420_v10 = vadd.f32 %v1400_v34, %v1339_v46  ;;  %v1340_v16 = vadd.f32 %v1320_v3, %v619_v30  ;;  %v623_v54 = vpop.f32.mrb[8].mxu0  ;;  %v1129_v25 = vadd.s32 20, %v3083_v8  ;;  %v3133_v38 = vadd.s32 20, %v3105_v45 }
 0x174   : > { %v2195_v56 = vpop.f32.mrb[8].mxu1  ;;  %v1280_v7 = vrot.slane %v623_v54, 7  ;;  %v625_v15 = vpop.f32.mrb[9].mxu0  ;;  %v1402_v49 = vmul.f32 %v2949_v22, %v1392_v33  ;;  %v1403_v22 = vmul.f32 %v2961_v26, %v1391_v27  ;;  %vm1168_vm4 = vcmp.ne.s32.totalorder %v3128_v28, 0 }
 0x175   : > { %v1367_v19 = vrot.slane %v2195_v56, 1  ;;  %v768_v24 = vpop.f32.mrb[9].mxu1  ;;  %v1447_v32 = vmul.f32 %v3124_v6, %v1420_v10  ;;  %v1421_v36 = vadd.f32 %v1401_v5, %v1340_v16  ;;  %v627_v37 = vpop.f32.mrb[10].mxu0  ;;  %v3141_v10 = vld [vmem:[%s3629_s3] ss:$0 sm:$0xff]  ;;  %vm1228_vm5 = vcmp.ne.s32.totalorder %v3128_v28, 19 }
 0x176   : > { %v1365_v34 = vrot.slane %v768_v24, 1  ;;  %v2196_v30 = vpop.f32.mrb[10].mxu1  ;;  %v1312_v46 = vsel %vm1296_vm10, %v1279_v29, %v1280_v7  ;;  %v1281_v3 = vrot.slane %v627_v37, 7  ;;  %v629_v54 = vpop.f32.mrb[11].mxu0  ;;  %v3172_v27 = vsub.s32 %v2980_v39, %v3085_v11 }
 0x177   : > { %v1368_v41 = vrot.slane %v2196_v30, 1  ;;  %v771_v20 = vpop.f32.mrb[11].mxu1  ;;  %v1321_v5 = vmul.f32 %v2937_v13, %v1312_v46  ;;  %v1448_v24 = vmul.f32 %v3124_v6, %v1421_v36  ;;  %v1474_v13 = vadd.f32 %v3141_v10, %v1447_v32 }
 0x178   : > { %v1389_v16 = vsel %vm1377_vm13, %v1364_v31, %v1365_v34  ;;  %v1366_v56 = vrot.slane %v771_v20, 1  ;;  %v1311_v29 = vsel %vm1296_vm10, %v1280_v7, %v1281_v3  ;;  %v3654_v1 = vshrl.u32 %v3116_v48, 4 }
 0x179   : > { %v3152_v33 = vsel %vm1377_vm13, %v1367_v19, %v1368_v41  ;;  %v1341_v31 = vadd.f32 %v1321_v5, %v625_v15  ;;  %v1322_v37 = vmul.f32 %v2953_v23, %v1311_v29  ;;  %v1475_v7 = vadd.f32 %v3141_v10, %v1448_v24 }
 0x17a   : > { %v3162_v36 = vsel %vm1377_vm13, %v1366_v56, %v1367_v19  ;;  %v3166_v26 = vsel %vm1377_vm13, %v1365_v34, %v1366_v56  ;;  %v3176_v19 = vsel %vm1109_vm3, %v1129_v25, %v3083_v8  ;;  %v1494_v29 = vmax.f32 %v1474_v13, 0.0 }
 0x17b   : > { %v1422_v15 = vadd.f32 %v1402_v49, %v1341_v31  ;;  %v1342_v23 = vadd.f32 %v1322_v37, %v629_v54  ;;  %v633_v32 = vpop.f32.mrb[12].mxu0  ;;  %v1495_v21 = vmax.f32 %v1475_v7, 0.0  ;;  %v1404_v49 = vmul.f32 %v3004_v51, %v3102_v42 }
 0x17c   : > { %v2199_v30 = vpop.f32.mrb[12].mxu1  ;;  %v1282_v46 = vrot.slane %v633_v32, 7  ;;  %v635_v20 = vpop.f32.mrb[13].mxu0  ;;  %vm1169_vm8 = vcmp.ne.s32.totalorder %v3176_v19, 0  ;;  %vm1229_vm9 = vcmp.ne.s32.totalorder %v3176_v19, 19  ;;  %vm1091_vm12 = vcmp.lt.s32.totalorder %v3172_v27, 0 }
 0x17d   : > { %v1371_v5 = vrot.slane %v2199_v30, 1  ;;  %v784_v56 = vpop.f32.mrb[13].mxu1  ;;  %v1449_v39 = vmul.f32 %v3124_v6, %v1422_v15  ;;  %v1423_v11 = vadd.f32 %v1403_v22, %v1342_v23  ;;  %v637_v54 = vpop.f32.mrb[14].mxu0  ;;  %v3184_v30 = vpack.c.bf16 %v1495_v21, %v1494_v29 }
 0x17e   : > { %v1369_v24 = vrot.slane %v784_v56, 1  ;;  %v2200_v31 = vpop.f32.mrb[14].mxu1  ;;  %v1310_v8 = vsel %vm1296_vm10, %v1281_v3, %v1282_v46  ;;  %v1283_v25 = vrot.slane %v637_v54, 7  ;;  %v639_v37 = vpop.f32.mrb[15].mxu0  ;;  %v3202_v21 = vsel %vm1168_vm4, 1.0, %v3638_v61 }
 0x17f   : > { %v1372_v32 = vrot.slane %v2200_v31, 1  ;;  %v787_v34 = vpop.f32.mrb[15].mxu1  ;;  %v1450_v13 = vmul.f32 %v3124_v6, %v1423_v11  ;;  %v1476_v7 = vadd.f32 %v3141_v10, %v1449_v39  ;;  %v1323_v22 = vmul.f32 %v2995_v47, %v1310_v8 }
 0x180   : > { %v3191_v51 = vsel %vm1377_vm13, %v1368_v41, %v1369_v24  ;;  %v1309_v42 = vsel %vm1296_vm10, %v1282_v46, %v1283_v25  ;;  %v1370_v15 = vrot.slane %v787_v34, 1  ;;  %v3209_v41 = vsel %vm1228_vm5, 1.0, %v3638_v61 }
 0x181   : > { %v3197_v3 = vsel %vm1377_vm13, %v1371_v5, %v1372_v32  ;;  %v1477_v23 = vadd.f32 %v3141_v10, %v1450_v13  ;;  %v1343_v47 = vadd.f32 %v1323_v22, %v635_v20  ;;  %v1324_v56 = vmul.f32 %v3008_v53, %v1309_v42 }
 0x182   : > { %v1405_v34 = vmul.f32 %v3015_v57, %v1389_v16  ;;  %v3216_v46 = vsel %vm1377_vm13, %v1370_v15, %v1371_v5  ;;  %v3220_v20 = vsel %vm1377_vm13, %v1369_v24, %v1370_v15  ;;  %v1496_v53 = vmax.f32 %v1476_v7, 0.0 }
 0x183   : > { %v1497_v28 = vmax.f32 %v1477_v23, 0.0  ;;  %v1424_v29 = vadd.f32 %v1404_v49, %v1343_v47  ;;  %v1344_v39 = vadd.f32 %v1324_v56, %v639_v37  ;;  %v643_v11 = vpop.f32.mrb[16].mxu0  ;;  %v1406_v37 = vmul.f32 %v3023_v59, %v3166_v26 }
 0x184   : > { %v2203_v54 = vpop.f32.mrb[16].mxu1  ;;  %v1284_v31 = vrot.slane %v643_v11, 7  ;;  %v645_v13 = vpop.f32.mrb[17].mxu0  ;;  %v3224_v16 = vmul.u32.u64.low 3435973837, %v3088_v17  ;;  %v3225_v5 = vmul.u32.u64.high 3435973837, %v3088_v17, %v3224_v16  ;;  %v1408_v19 = vmul.f32 %v3067_v43, %v3152_v33 }
 0x185   : > { %v1375_v8 = vrot.slane %v2203_v54, 1  ;;  %v800_v57 = vpop.f32.mrb[17].mxu1  ;;  %v1514_v22 = vpack.c.bf16 %v1497_v28, %v1496_v53  ;;  %v1451_v24 = vmul.f32 %v3124_v6, %v1424_v29  ;;  %v1425_v42 = vadd.f32 %v1405_v34, %v1344_v39  ;;  %v647_v61 = vpop.f32.mrb[18].mxu0 }
 0x186   : > { %v1373_v15 = vrot.slane %v800_v57, 1  ;;  %v2204_v7 = vpop.f32.mrb[18].mxu1  ;;  %v1308_v49 = vsel %vm1296_vm10, %v1283_v25, %v1284_v31  ;;  %v1285_v23 = vrot.slane %v647_v61, 7  ;;  %v649_v56 = vpop.f32.mrb[19].mxu0  ;;  %v1019_v39 = vmul.u32 20, %v3654_v1 }
 0x187   : > { %v1376_v47 = vrot.slane %v2204_v7, 1  ;;  %v803_v11 = vpop.f32.mrb[19].mxu1  ;;  %v1452_v54 = vmul.f32 %v3124_v6, %v1425_v42  ;;  %v1325_v53 = vmul.f32 %v3019_v58, %v1308_v49  ;;  %1671 = vmatmul.mubr.bf16.vlgmr.msra.gmra.mrb[20].mxu1 %v1514_v22  ;;  %v1478_v28 = vadd.f32 %v3141_v10, %v1451_v24 }
 0x188   : > { %v3236_v34 = vsel %vm1377_vm13, %v1372_v32, %v1373_v15  ;;  %v1307_v58 = vsel %vm1296_vm10, %v1284_v31, %v1285_v23  ;;  %1680 = vmatprep.mubr.bf16.mxu1 %v2574_v0  ;;  %v1407_v32 = vmul.f32 %v3035_v4, %v3162_v36  ;;  %v1029_v49 = vshrl.u32 %v3225_v5, 4 }
 0x189   : > { %v3241_v25 = vsel %vm1377_vm13, %v1375_v8, %v1376_v47  ;;  %v3247_v61 = vsel %vm1377_vm13, %v1376_v47, %v1357_v14  ;;  %v1345_v59 = vadd.f32 %v1325_v53, %v645_v13  ;;  %v1326_v26 = vmul.f32 %v3027_v60, %v1307_v58 }
 0x18a   : > { %v1479_v29 = vadd.f32 %v3141_v10, %v1452_v54  ;;  %v1374_v14 = vrot.slane %v803_v11, 1  ;;  %v3260_v57 = vmul.u32.u64.low 3435973837, %v3119_v35  ;;  %v3261_v16 = vmul.u32.u64.high 3435973837, %v3119_v35, %v3260_v57 }
 0x18b   : > { %v1426_v31 = vadd.f32 %v1406_v37, %v1345_v59  ;;  %v1346_v22 = vadd.f32 %v1326_v26, %v649_v56  ;;  %v653_v24 = vpop.f32.mrb[20].mxu0  ;;  %v1498_v42 = vmax.f32 %v1478_v28, 0.0  ;;  %v3657_v54 = vmov 0.0  }
 0x18c   : > { %v1499_v13 = vmax.f32 %v1479_v29, 0.0  ;;  %v1286_v7 = vrot.slane %v653_v24, 7  ;;  %v655_v60 = vpop.f32.mrb[21].mxu0  ;;  %v3273_v48 = vsel %vm1377_vm13, %v1374_v14, %v1375_v8  ;;  %v3277_v36 = vsel %vm1377_vm13, %v1373_v15, %v1374_v14 }
 0x18d   : > { %v1453_v37 = vmul.f32 %v3124_v6, %v1426_v31  ;;  %v1427_v47 = vadd.f32 %v1407_v32, %v1346_v22  ;;  %v657_v56 = vpop.f32.mrb[22].mxu0  ;;  %v2098_v53 = vsel %vm1169_vm8, 1.0, %v3657_v54  ;;  %v2118_v15 = vsel %vm1229_vm9, 1.0, %v3657_v54 }
 0x18e   : > { %v1515_v11 = vpack.c.bf16 %v1499_v13, %v1498_v42  ;;  %v1306_v28 = vsel %vm1296_vm10, %v1285_v23, %v1286_v7  ;;  %v1287_v8 = vrot.slane %v657_v56, 7  ;;  %v659_v58 = vpop.f32.mrb[23].mxu0  ;;  %v1020_v5 = vsub.s32 %v3080_v2, %v1019_v39 }
 0x18f   : > { %v1454_v59 = vmul.f32 %v3124_v6, %v1427_v47  ;;  %v1327_v26 = vmul.f32 %v3043_v18, %v1306_v28  ;;  %v1480_v32 = vadd.f32 %v3141_v10, %v1453_v37  ;;  %v3297_v23 = vsel %vm3267_vm11, %v3133_v38, %v3105_v45 }
 0x190   : > { %1681 = vmatmul.mubr.bf16.gmra.mrb[24].mxu1 %v1515_v11  ;;  %v1305_v29 = vsel %vm1296_vm10, %v1286_v7, %v1287_v8  ;;  %vm1071_vm13 = vcmp.ne.s32.totalorder %v3172_v27, 0  ;;  %v1030_v2 = vmul.u32 20, %v1029_v49  ;;  %v1409_v45 = vmul.f32 %v3077_v50, %v3191_v51 }
 0x191   : > { %1690 = vmatprep.mubr.bf16.mxu1 %v2574_v0  ;;  %v1347_v18 = vadd.f32 %v1327_v26, %v655_v60  ;;  %v1328_v1 = vmul.f32 %v3070_v44, %v1305_v29  ;;  %v1481_v39 = vadd.f32 %v3141_v10, %v1454_v59  ;;  %vm1170_vm14 = vcmp.ne.s32.totalorder %v3297_v23, 0  ;;  %vm1111_vm0 = vmand %vm1091_vm12, %vm1071_vm13 }
 0x192   : > { %v1131_v38 = vadd.s32 20, %v3172_v27  ;;  %vm1072_vm15 = vcmp.ne.s32.totalorder %v1020_v5, 0  ;;  %v1500_v22 = vmax.f32 %v1480_v32, 0.0  ;;  %vm1092_vm1 = vcmp.lt.s32.totalorder %v1020_v5, 0 }
 0x193   : > { %v1428_v14 = vadd.f32 %v1408_v19, %v1347_v18  ;;  %v1348_v57 = vadd.f32 %v1328_v1, %v659_v58  ;;  %v663_v31 = vpop.f32.mrb[24].mxu0  ;;  %v1501_v24 = vmax.f32 %v1481_v39, 0.0  ;;  %v1031_v50 = vsub.s32 %v3088_v17, %v1030_v2  ;;  %vm1112_vm3 = vmand %vm1092_vm1, %vm1072_vm15 }
 0x194   : > { %v1288_v43 = vrot.slane %v663_v31, 7  ;;  %v665_v44 = vpop.f32.mrb[25].mxu0  ;;  %v1040_v33 = vshrl.u32 %v3261_v16, 4  ;;  %vm1230_vm2 = vcmp.ne.s32.totalorder %v3297_v23, 19  ;;  %v1151_v37 = vsel %vm1111_vm0, %v1131_v38, %v3172_v27 }
 0x195   : > { %v1455_v51 = vmul.f32 %v3124_v6, %v1428_v14  ;;  %v1429_v42 = vadd.f32 %v1409_v45, %v1348_v57  ;;  %v667_v13 = vpop.f32.mrb[26].mxu0  ;;  %v1516_v7 = vpack.c.bf16 %v1501_v24, %v1500_v22  ;;  %v1132_v47 = vadd.s32 20, %v1020_v5 }
 0x196   : > { %v1304_v60 = vsel %vm1296_vm10, %v1287_v8, %v1288_v43  ;;  %v1289_v4 = vrot.slane %v667_v13, 7  ;;  %v669_v49 = vpop.f32.mrb[27].mxu0  ;;  %v1410_v16 = vmul.f32 %v3209_v41, %v3220_v20  ;;  %vm1073_vm4 = vcmp.ne.s32.totalorder %v1031_v50, 0 }
 0x197   : > { %v1456_v56 = vmul.f32 %v3124_v6, %v1429_v42  ;;  %v1329_v17 = vmul.f32 %v3202_v21, %v1304_v60  ;;  %v1482_v11 = vadd.f32 %v3141_v10, %v1455_v51  ;;  %vm1093_vm5 = vcmp.lt.s32.totalorder %v1031_v50, 0 }
 0x198   : > { %1691 = vmatmul.mubr.bf16.gmra.mrb[28].mxu1 %v1516_v7  ;;  %v1303_v28 = vsel %vm1296_vm10, %v1288_v43, %v1289_v4  ;;  %v1041_v27 = vmul.u32 20, %v1040_v33  ;;  %v1411_v21 = vmul.f32 %v2118_v15, %v3216_v46  ;;  %vm1171_vm6 = vcmp.ne.s32.totalorder %v1151_v37, 0  ;;  %vm1113_vm11 = vmand %vm1093_vm5, %vm1073_vm4 }
 0x199   : > { %1700 = vmatprep.mubr.bf16.mxu1 %v2574_v0  ;;  %v1349_v8 = vadd.f32 %v1329_v17, %v665_v44  ;;  %v1330_v58 = vmul.f32 %v2098_v53, %v1303_v28  ;;  %v1483_v41 = vadd.f32 %v3141_v10, %v1456_v56  ;;  %vm1231_vm7 = vcmp.ne.s32.totalorder %v1151_v37, 19 }
 0x19a   : > { %v1152_v20 = vsel %vm1112_vm3, %v1132_v47, %v1020_v5  ;;  %v1133_v59 = vadd.s32 20, %v1031_v50  ;;  %vm1075_vm8 = vcmp.ne.s32.totalorder %v3073_v62, 0  ;;  %vm1095_vm9 = vcmp.lt.s32.totalorder %v3073_v62, 0 }
 0x19b   : > { %v1430_v26 = vadd.f32 %v1410_v16, %v1349_v8  ;;  %v1350_v32 = vadd.f32 %v1330_v58, %v669_v49  ;;  %v673_v29 = vpop.f32.mrb[28].mxu0  ;;  %v1502_v2 = vmax.f32 %v1482_v11, 0.0  ;;  %v1503_v18 = vmax.f32 %v1483_v41, 0.0  ;;  %vm1115_vm3 = vmand %vm1095_vm9, %vm1075_vm8 }
 0x19c   : > { %v1290_v19 = vrot.slane %v673_v29, 7  ;;  %v675_v1 = vpop.f32.mrb[29].mxu0  ;;  %v2099_v46 = vsel %vm1170_vm14, 1.0, %v3657_v54  ;;  %v2119_v53 = vsel %vm1230_vm2, 1.0, %v3657_v54  ;;  %v1042_v15 = vsub.s32 %v3119_v35, %v1041_v27 }
 0x19d   : > { %v1457_v5 = vmul.f32 %v3124_v6, %v1430_v26  ;;  %v1431_v39 = vadd.f32 %v1411_v21, %v1350_v32  ;;  %v677_v45 = vpop.f32.mrb[30].mxu0  ;;  %v2100_v38 = vsel %vm1171_vm6, 1.0, %v3657_v54  ;;  %v1517_v14 = vpack.c.bf16 %v1503_v18, %v1502_v2 }
 0x19e   : > { %v1302_v57 = vsel %vm1296_vm10, %v1289_v4, %v1290_v19  ;;  %v1291_v31 = vrot.slane %v677_v45, 7  ;;  %v679_v22 = vpop.f32.mrb[31].mxu0  ;;  %v2120_v23 = vsel %vm1231_vm7, 1.0, %v3657_v54  ;;  %vm1172_vm13 = vcmp.ne.s32.totalorder %v1152_v20, 0 }
 0x19f   : > { %v1458_v24 = vmul.f32 %v3124_v6, %v1431_v39  ;;  %v1331_v35 = vmul.f32 %v2099_v46, %v1302_v57  ;;  %v1153_v43 = vsel %vm1113_vm11, %v1133_v59, %v1031_v50  ;;  %v1484_v44 = vadd.f32 %v3141_v10, %v1457_v5 }
 0x1a0   : > { %1701 = vmatmul.mubr.bf16.gmra.mrb[32].mxu1 %v1517_v14  ;;  %v1301_v33 = vsel %vm1296_vm10, %v1290_v19, %v1291_v31  ;;  %vm1232_vm12 = vcmp.ne.s32.totalorder %v1152_v20, 19  ;;  %vm1074_vm14 = vcmp.ne.s32.totalorder %v1042_v15, 0  ;;  %vm1094_vm15 = vcmp.lt.s32.totalorder %v1042_v15, 0 }
 0x1a1   : > { %1710 = vmatprep.mubr.bf16.mxu1 %v2574_v0  ;;  %v1351_v51 = vadd.f32 %v1331_v35, %v675_v1  ;;  %v1412_v42 = vmul.f32 %v2119_v53, %v3197_v3  ;;  %v1332_v13 = vmul.f32 %v2100_v38, %v1301_v33  ;;  %v1485_v7 = vadd.f32 %v3141_v10, %v1458_v24  ;;  %vm3362_vm2 = vmand %vm1094_vm15, %vm1074_vm14 }
 0x1a2   : > { %v1413_v60 = vmul.f32 %v2120_v23, %v3236_v34  ;;  %vm1173_vm0 = vcmp.ne.s32.totalorder %v1153_v43, 0  ;;  %vm1233_vm1 = vcmp.ne.s32.totalorder %v1153_v43, 19  ;;  %v1134_v50 = vadd.s32 20, %v1042_v15 }
 0x1a3   : > { %v1432_v4 = vadd.f32 %v1412_v42, %v1351_v51  ;;  %v1352_v49 = vadd.f32 %v1332_v13, %v679_v22  ;;  %v683_v37 = vpop.f32.mrb[32].mxu0  ;;  %v1504_v47 = vmax.f32 %v1484_v44, 0.0  ;;  %v1505_v56 = vmax.f32 %v1485_v7, 0.0 }
 0x1a4   : > { %v1292_v16 = vrot.slane %v683_v37, 7  ;;  %v685_v3 = vpop.f32.mrb[33].mxu0  ;;  %v2101_v11 = vsel %vm1172_vm13, 1.0, %v3657_v54  ;;  %v2121_v34 = vsel %vm1232_vm12, 1.0, %v3657_v54  ;;  %v1135_v28 = vadd.s32 20, %v3073_v62 }
 0x1a5   : > { %v1459_v27 = vmul.f32 %v3124_v6, %v1432_v4  ;;  %v1433_v8 = vadd.f32 %v1413_v60, %v1352_v49  ;;  %v687_v58 = vpop.f32.mrb[34].mxu0  ;;  %v2102_v21 = vsel %vm1173_vm0, 1.0, %v3657_v54  ;;  %v1518_v41 = vpack.c.bf16 %v1505_v56, %v1504_v47 }
 0x1a6   : > { %v1300_v59 = vsel %vm1296_vm10, %v1291_v31, %v1292_v16  ;;  %v1293_v20 = vrot.slane %v687_v58, 7  ;;  %v689_v26 = vpop.f32.mrb[35].mxu0  ;;  %v2122_v32 = vsel %vm1233_vm1, 1.0, %v3657_v54  ;;  %v1154_v29 = vsel %vm3362_vm2, %v1134_v50, %v1042_v15 }
 0x1a7   : > { %v1460_v2 = vmul.f32 %v3124_v6, %v1433_v8  ;;  %v1333_v18 = vmul.f32 %v2101_v11, %v1300_v59  ;;  %v1414_v19 = vmul.f32 %v2121_v34, %v3277_v36  ;;  %v1486_v1 = vadd.f32 %v3141_v10, %v1459_v27 }
 0x1a8   : > { %1711 = vmatmul.mubr.bf16.gmra.mrb[36].mxu1 %v1518_v41  ;;  %vm1216_vm4 = vcmp.ne.s32.totalorder %v2929_v9, 19  ;;  %v1299_v46 = vsel %vm1296_vm10, %v1292_v16, %v1293_v20  ;;  %vm1174_vm5 = vcmp.ne.s32.totalorder %v1154_v29, 0  ;;  %v1155_v53 = vsel %vm1115_vm3, %v1135_v28, %v3073_v62 }
 0x1a9   : > { %1720 = vmatprep.mubr.bf16.mxu1 %v2574_v0  ;;  %v1353_v5 = vadd.f32 %v1333_v18, %v685_v3  ;;  %v1334_v15 = vmul.f32 %v2102_v21, %v1299_v46  ;;  %v1415_v39 = vmul.f32 %v2122_v32, %v3273_v48  ;;  %v1487_v45 = vadd.f32 %v3141_v10, %v1460_v2 }
 0x1aa   : > { %vm1234_vm6 = vcmp.ne.s32.totalorder %v1154_v29, 19  ;;  %vm1156_vm7 = vcmp.ne.s32.totalorder %v2929_v9, 0  ;;  %vm1175_vm8 = vcmp.ne.s32.totalorder %v1155_v53, 0  ;;  %v1506_v57 = vmax.f32 %v1486_v1, 0.0 }
 0x1ab   : > { %v1434_v36 = vadd.f32 %v1414_v19, %v1353_v5  ;;  %v1354_v38 = vadd.f32 %v1334_v15, %v689_v26  ;;  %v693_v14 = vpop.f32.mrb[36].mxu0  ;;  %v1507_v31 = vmax.f32 %v1487_v45, 0.0  ;;  %v2105_v62 = vsel %vm1216_vm4, 1.0, %v3657_v54  ;;  %v1751_v5 = vld [vmem:[%s3631_s5] sm:$0x3] }
 0x1ac   : > { %v1294_v22 = vrot.slane %v693_v14, 7  ;;  %v695_v23 = vpop.f32.mrb[37].mxu0  ;;  %v2103_v48 = vsel %vm1174_vm5, 1.0, %v3657_v54  ;;  %vm1235_vm9 = vcmp.ne.s32.totalorder %v1155_v53, 19  ;;  %v2123_v35 = vsel %vm1234_vm6, 1.0, %v3657_v54 }
 0x1ad   : > { %v1435_v24 = vadd.f32 %v1415_v39, %v1354_v38  ;;  %v697_v43 = vpop.f32.mrb[38].mxu0  ;;  %v1519_v44 = vpack.c.bf16 %v1507_v31, %v1506_v57  ;;  %v1461_v33 = vmul.f32 %v3124_v6, %v1434_v36  ;;  %v2085_v42 = vsel %vm1156_vm7, 1.0, %v3657_v54  ;;  %v1803_v15 = vld [vmem:[%s3632_s6] sm:$0x3] }
 0x1ae   : > { %v1298_v51 = vsel %vm1296_vm10, %v1293_v20, %v1294_v22  ;;  %v1295_v13 = vrot.slane %v697_v43, 7  ;;  %v699_v7 = vpop.f32.mrb[39].mxu0  ;;  %v2104_v60 = vsel %vm1175_vm8, 1.0, %v3657_v54  ;;  %v2124_v49 = vsel %vm1235_vm9, 1.0, %v3657_v54 }
 0x1af   : > { %v1462_v50 = vmul.f32 %v3124_v6, %v1435_v24  ;;  %v1335_v4 = vmul.f32 %v2103_v48, %v1298_v51  ;;  %v1488_v37 = vadd.f32 %v3141_v10, %v1461_v33  ;;  %v1416_v47 = vmul.f32 %v2123_v35, %v3241_v25 }
 0x1b0   : > { %1721 = vmatmul.mubr.bf16.gmra.mrb[40].mxu1 %v1519_v44  ;;  %v3660_v56 = vrot.slane %v3011_v55, 7  ;;  %v1297_v17 = vsel %vm1296_vm10, %v1294_v22, %v1295_v13  ;;  %v1398_v34 = vmul.f32 %v2105_v62, %v3061_v40  ;;  %v1446_v25 = vmul.f32 %v3124_v6, %v3090_v12 }
 0x1b1   : > { %1730 = vmatprep.mubr.bf16.mxu1 %v2574_v0  ;;  %v1355_v16 = vadd.f32 %v1335_v4, %v695_v23  ;;  %v1336_v11 = vmul.f32 %v2104_v60, %v1297_v17  ;;  %v1489_v54 = vadd.f32 %v3141_v10, %v1462_v50  ;;  %v1417_v55 = vmul.f32 %v2124_v49, %v3247_v61 }
 0x1b2   : > { %v1316_v9 = vsel %vm1296_vm10, %v1295_v13, %v3660_v56  ;;  %v1508_v28 = vmax.f32 %v1488_v37, 0.0  ;;  %v1473_v32 = vadd.f32 %v3141_v10, %v1446_v25 }
 0x1b3   : > { %v1317_v3 = vmul.f32 %v2085_v42, %v1316_v9  ;;  %v1436_v27 = vadd.f32 %v1416_v47, %v1355_v16  ;;  %v1356_v58 = vadd.f32 %v1336_v11, %v699_v7  ;;  %v1509_v21 = vmax.f32 %v1489_v54, 0.0 }
 0x1b4   : > { %v1493_v2 = vmax.f32 %v1473_v32, 0.0 }
 0x1b5   : > { %v1337_v8 = vadd.f32 %v1317_v3, %v3029_v63  ;;  %v1463_v41 = vmul.f32 %v3124_v6, %v1436_v27  ;;  %v1437_v20 = vadd.f32 %v1417_v55, %v1356_v58  ;;  %v1520_v26 = vpack.c.bf16 %v1509_v21, %v1508_v28 }
 0x1b7   : > { %v1418_v59 = vadd.f32 %v1398_v34, %v1337_v8  ;;  %v1464_v29 = vmul.f32 %v3124_v6, %v1437_v20  ;;  %v1490_v12 = vadd.f32 %v3141_v10, %v1463_v41 }
 0x1b8   : > { %1731 = vmatmul.mubr.bf16.gmra.mrb[44].mxu1 %v1520_v26 }
 0x1b9   : > { %v1445_v40 = vmul.f32 %v3124_v6, %v1418_v59  ;;  %1740 = vmatprep.mubr.bf16.mxu1 %v2574_v0  ;;  %v1491_v61 = vadd.f32 %v3141_v10, %v1464_v29  ;;  %v1510_v19 = vmax.f32 %v1490_v12, 0.0  ;;  %v1755_v6 = vsub.s32 0, %v2827_v52 }
 0x1bb   : > { %v1472_v63 = vadd.f32 %v3141_v10, %v1445_v40  ;;  %v1511_v1 = vmax.f32 %v1491_v61, 0.0  ;;  %v1759_v10 = vsub.s32 1, %v2827_v52  ;;  %v3444_v39 = vrot.slane %v1751_v5, %v1755_v6 }
 0x1bc   : > { %v3448_v36 = vrot.slane %v1803_v15, %v1755_v6 }
 0x1bd   : > { %v1492_v18 = vmax.f32 %v1472_v63, 0.0  ;;  %v1521_v53 = vpack.c.bf16 %v1511_v1, %v1510_v19  ;;  %v3446_v45 = vrot.slane %v1751_v5, %v1759_v10 }
 0x1bf   : > { %v1512_v46 = vpack.c.bf16 %v1493_v2, %v1492_v18 }
 0x1c0   : > { %1741 = vmatmul.mubr.bf16.gmra.mrb[48].mxu1 %v1521_v53 }
 0x1c1   : > { %1651 = vmatmul.mubr.bf16.vlgmr.msra.gmra.mrb[40].mxu0 %v1512_v46 }
 0x1c2   : > { %1660 = vmatprep.mubr.bf16.mxu0 %v2574_v0 }
 0x1c9   : > { %1661 = vmatmul.mubr.bf16.gmra.mrb[44].mxu0 %v3184_v30  ;;  %v3451_v30 = vrot.slane %v1803_v15, %v1759_v10 }
 0x25a   : > { %v1672_v0 = vpop.f32.mrb[20].mxu1 }
 0x25b   : > { %v1771_v38 = vmul.f32 %v3444_v39, %v1672_v0  ;;  %v1674_v14 = vpop.f32.mrb[21].mxu1 }
 0x25c   : > { %v1772_v57 = vmul.f32 %v3446_v45, %v1674_v14  ;;  %v1676_v52 = vpop.f32.mrb[22].mxu1 }
 0x25d   : > { %v1823_v31 = vadd.f32 %v3448_v36, %v1771_v38  ;;  %v1773_v62 = vmul.f32 %v3444_v39, %v1676_v52  ;;  %v1678_v22 = vpop.f32.mrb[23].mxu1 }
 0x25e   : > { %v1824_v23 = vadd.f32 %v3451_v30, %v1772_v57  ;;  %v1774_v48 = vmul.f32 %v3446_v45, %v1678_v22 }
 0x25f   : > { %v1863_v24 = vmax.f32 %v1823_v31, 0.0  ;;  %v1825_v35 = vadd.f32 %v3448_v36, %v1773_v62 }
 0x260   : > { %v1864_v43 = vmax.f32 %v1824_v23, 0.0  ;;  %v1826_v44 = vadd.f32 %v3451_v30, %v1774_v48 }
 0x261   : > { %1903 = vst [vmem:[%s3461_s15 + $0x40] sm:$0xff] %v1863_v24  ;;  %v1865_v33 = vmax.f32 %v1825_v35, 0.0 }
 0x262   : > { %1904 = vst [vmem:[%s3461_s15 + $0x48] sm:$0xff] %v1864_v43  ;;  %v1866_v51 = vmax.f32 %v1826_v44, 0.0 }
 0x263   : > { %v1682_v42 = vpop.f32.mrb[24].mxu1  ;;  %1905 = vst [vmem:[%s3461_s15 + $0x50] sm:$0xff] %v1865_v33 }
 0x264   : > { %v1775_v13 = vmul.f32 %v3444_v39, %v1682_v42  ;;  %v1684_v7 = vpop.f32.mrb[25].mxu1  ;;  %1906 = vst [vmem:[%s3461_s15 + $0x58] sm:$0xff] %v1866_v51 }
 0x265   : > { %v1776_v60 = vmul.f32 %v3446_v45, %v1684_v7  ;;  %v1686_v50 = vpop.f32.mrb[26].mxu1 }
 0x266   : > { %v1827_v4 = vadd.f32 %v3448_v36, %v1775_v13  ;;  %v1777_v49 = vmul.f32 %v3444_v39, %v1686_v50  ;;  %v1688_v37 = vpop.f32.mrb[27].mxu1 }
 0x267   : > { %v1828_v47 = vadd.f32 %v3451_v30, %v1776_v60  ;;  %v1778_v56 = vmul.f32 %v3446_v45, %v1688_v37 }
 0x268   : > { %v1867_v9 = vmax.f32 %v1827_v4, 0.0  ;;  %v1829_v17 = vadd.f32 %v3448_v36, %v1777_v49 }
 0x269   : > { %v1868_v16 = vmax.f32 %v1828_v47, 0.0  ;;  %v1830_v3 = vadd.f32 %v3451_v30, %v1778_v56 }
 0x26a   : > { %1907 = vst [vmem:[%s3461_s15 + $0x60] sm:$0xff] %v1867_v9  ;;  %v1869_v11 = vmax.f32 %v1829_v17, 0.0 }
 0x26b   : > { %1908 = vst [vmem:[%s3461_s15 + $0x68] sm:$0xff] %v1868_v16  ;;  %v1870_v54 = vmax.f32 %v1830_v3, 0.0  ;;  %v1692_v34 = vpop.f32.mrb[28].mxu1 }
 0x26c   : > { %1909 = vst [vmem:[%s3461_s15 + $0x70] sm:$0xff] %v1869_v11  ;;  %v1779_v25 = vmul.f32 %v3444_v39, %v1692_v34  ;;  %v1694_v55 = vpop.f32.mrb[29].mxu1 }
 0x26d   : > { %1910 = vst [vmem:[%s3461_s15 + $0x78] sm:$0xff] %v1870_v54  ;;  %v1780_v28 = vmul.f32 %v3446_v45, %v1694_v55  ;;  %v1696_v27 = vpop.f32.mrb[30].mxu1 }
 0x26e   : > { %v1831_v8 = vadd.f32 %v3448_v36, %v1779_v25  ;;  %v1781_v58 = vmul.f32 %v3444_v39, %v1696_v27  ;;  %v1698_v21 = vpop.f32.mrb[31].mxu1 }
 0x26f   : > { %v1832_v41 = vadd.f32 %v3451_v30, %v1780_v28  ;;  %v1782_v59 = vmul.f32 %v3446_v45, %v1698_v21 }
 0x270   : > { %v1871_v20 = vmax.f32 %v1831_v8, 0.0  ;;  %v1833_v26 = vadd.f32 %v3448_v36, %v1781_v58 }
 0x271   : > { %v1872_v32 = vmax.f32 %v1832_v41, 0.0  ;;  %v1834_v40 = vadd.f32 %v3451_v30, %v1782_v59 }
 0x272   : > { %1911 = vst [vmem:[%s3461_s15 + $0x80] sm:$0xff] %v1871_v20  ;;  %v1873_v29 = vmax.f32 %v1833_v26, 0.0 }
 0x273   : > { %1912 = vst [vmem:[%s3461_s15 + $0x88] sm:$0xff] %v1872_v32  ;;  %v1874_v12 = vmax.f32 %v1834_v40, 0.0  ;;  %v1702_v63 = vpop.f32.mrb[32].mxu1 }
 0x274   : > { %1913 = vst [vmem:[%s3461_s15 + $0x90] sm:$0xff] %v1873_v29  ;;  %v1783_v61 = vmul.f32 %v3444_v39, %v1702_v63  ;;  %v1704_v2 = vpop.f32.mrb[33].mxu1 }
 0x275   : > { %1914 = vst [vmem:[%s3461_s15 + $0x98] sm:$0xff] %v1874_v12  ;;  %v1784_v18 = vmul.f32 %v3446_v45, %v1704_v2  ;;  %v1706_v19 = vpop.f32.mrb[34].mxu1 }
 0x276   : > { %v1835_v1 = vadd.f32 %v3448_v36, %v1783_v61  ;;  %v1785_v46 = vmul.f32 %v3444_v39, %v1706_v19  ;;  %v1708_v53 = vpop.f32.mrb[35].mxu1 }
 0x277   : > { %v1836_v6 = vadd.f32 %v3451_v30, %v1784_v18  ;;  %v1786_v5 = vmul.f32 %v3446_v45, %v1708_v53 }
 0x278   : > { %v1875_v10 = vmax.f32 %v1835_v1, 0.0  ;;  %v1837_v15 = vadd.f32 %v3448_v36, %v1785_v46 }
 0x279   : > { %v1876_v0 = vmax.f32 %v1836_v6, 0.0  ;;  %v1838_v38 = vadd.f32 %v3451_v30, %v1786_v5 }
 0x27a   : > { %1915 = vst [vmem:[%s3461_s15 + $0xa0] sm:$0xff] %v1875_v10  ;;  %v1877_v14 = vmax.f32 %v1837_v15, 0.0 }
 0x27b   : > { %1916 = vst [vmem:[%s3461_s15 + $0xa8] sm:$0xff] %v1876_v0  ;;  %v1878_v57 = vmax.f32 %v1838_v38, 0.0  ;;  %v1712_v52 = vpop.f32.mrb[36].mxu1 }
 0x27c   : > { %1917 = vst [vmem:[%s3461_s15 + $0xb0] sm:$0xff] %v1877_v14  ;;  %v1787_v31 = vmul.f32 %v3444_v39, %v1712_v52  ;;  %v1714_v62 = vpop.f32.mrb[37].mxu1 }
 0x27d   : > { %1918 = vst [vmem:[%s3461_s15 + $0xb8] sm:$0xff] %v1878_v57  ;;  %v1788_v22 = vmul.f32 %v3446_v45, %v1714_v62  ;;  %v1716_v23 = vpop.f32.mrb[38].mxu1 }
 0x27e   : > { %v1839_v48 = vadd.f32 %v3448_v36, %v1787_v31  ;;  %v1789_v24 = vmul.f32 %v3444_v39, %v1716_v23  ;;  %v1718_v35 = vpop.f32.mrb[39].mxu1 }
 0x27f   : > { %v1840_v43 = vadd.f32 %v3451_v30, %v1788_v22  ;;  %v1790_v44 = vmul.f32 %v3446_v45, %v1718_v35 }
 0x280   : > { %v1879_v33 = vmax.f32 %v1839_v48, 0.0  ;;  %v1841_v51 = vadd.f32 %v3448_v36, %v1789_v24 }
 0x281   : > { %v1880_v42 = vmax.f32 %v1840_v43, 0.0  ;;  %v1842_v13 = vadd.f32 %v3451_v30, %v1790_v44 }
 0x282   : > { %1919 = vst [vmem:[%s3461_s15 + $0xc0] sm:$0xff] %v1879_v33  ;;  %v1881_v7 = vmax.f32 %v1841_v51, 0.0 }
 0x283   : > { %1920 = vst [vmem:[%s3461_s15 + $0xc8] sm:$0xff] %v1880_v42  ;;  %v1882_v60 = vmax.f32 %v1842_v13, 0.0  ;;  %v1722_v50 = vpop.f32.mrb[40].mxu1 }
 0x284   : > { %1921 = vst [vmem:[%s3461_s15 + $0xd0] sm:$0xff] %v1881_v7  ;;  %v1791_v4 = vmul.f32 %v3444_v39, %v1722_v50  ;;  %v1724_v49 = vpop.f32.mrb[41].mxu1 }
 0x285   : > { %1922 = vst [vmem:[%s3461_s15 + $0xd8] sm:$0xff] %v1882_v60  ;;  %v1792_v37 = vmul.f32 %v3446_v45, %v1724_v49  ;;  %v1726_v47 = vpop.f32.mrb[42].mxu1 }
 0x286   : > { %v1843_v56 = vadd.f32 %v3448_v36, %v1791_v4  ;;  %v1793_v9 = vmul.f32 %v3444_v39, %v1726_v47  ;;  %v1728_v17 = vpop.f32.mrb[43].mxu1 }
 0x287   : > { %v1844_v16 = vadd.f32 %v3451_v30, %v1792_v37  ;;  %v1794_v3 = vmul.f32 %v3446_v45, %v1728_v17 }
 0x288   : > { %v1883_v11 = vmax.f32 %v1843_v56, 0.0  ;;  %v1845_v54 = vadd.f32 %v3448_v36, %v1793_v9 }
 0x289   : > { %v1884_v34 = vmax.f32 %v1844_v16, 0.0  ;;  %v1846_v25 = vadd.f32 %v3451_v30, %v1794_v3 }
 0x28a   : > { %1923 = vst [vmem:[%s3461_s15 + $0xe0] sm:$0xff] %v1883_v11  ;;  %v1885_v55 = vmax.f32 %v1845_v54, 0.0 }
 0x28b   : > { %1924 = vst [vmem:[%s3461_s15 + $0xe8] sm:$0xff] %v1884_v34  ;;  %v1886_v28 = vmax.f32 %v1846_v25, 0.0  ;;  %v1732_v27 = vpop.f32.mrb[44].mxu1 }
 0x28c   : > { %1925 = vst [vmem:[%s3461_s15 + $0xf0] sm:$0xff] %v1885_v55  ;;  %v1795_v8 = vmul.f32 %v3444_v39, %v1732_v27  ;;  %v1734_v58 = vpop.f32.mrb[45].mxu1 }
 0x28d   : > { %1926 = vst [vmem:[%s3461_s15 + $0xf8] sm:$0xff] %v1886_v28  ;;  %v1796_v21 = vmul.f32 %v3446_v45, %v1734_v58  ;;  %v1736_v41 = vpop.f32.mrb[46].mxu1 }
 0x28e   : > { %v1847_v59 = vadd.f32 %v3448_v36, %v1795_v8  ;;  %v1797_v20 = vmul.f32 %v3444_v39, %v1736_v41  ;;  %v1738_v26 = vpop.f32.mrb[47].mxu1 }
 0x28f   : > { %v1848_v32 = vadd.f32 %v3451_v30, %v1796_v21  ;;  %v1798_v40 = vmul.f32 %v3446_v45, %v1738_v26 }
 0x290   : > { %v1887_v29 = vmax.f32 %v1847_v59, 0.0  ;;  %v1849_v12 = vadd.f32 %v3448_v36, %v1797_v20 }
 0x291   : > { %v1888_v63 = vmax.f32 %v1848_v32, 0.0  ;;  %v1850_v61 = vadd.f32 %v3451_v30, %v1798_v40 }
 0x292   : > { %1927 = vst [vmem:[%s3461_s15 + $0x100] sm:$0xff] %v1887_v29  ;;  %v1889_v2 = vmax.f32 %v1849_v12, 0.0 }
 0x293   : > { %1928 = vst [vmem:[%s3461_s15 + $0x108] sm:$0xff] %v1888_v63  ;;  %v1890_v18 = vmax.f32 %v1850_v61, 0.0  ;;  %v1742_v1 = vpop.f32.mrb[48].mxu1 }
 0x294   : > { %v1652_v19 = vpop.f32.mrb[40].mxu0  ;;  %1929 = vst [vmem:[%s3461_s15 + $0x110] sm:$0xff] %v1889_v2  ;;  %v1799_v53 = vmul.f32 %v3444_v39, %v1742_v1  ;;  %v1744_v5 = vpop.f32.mrb[49].mxu1 }
 0x295   : > { %v1763_v46 = vmul.f32 %v3444_v39, %v1652_v19  ;;  %v1654_v6 = vpop.f32.mrb[41].mxu0  ;;  %1930 = vst [vmem:[%s3461_s15 + $0x118] sm:$0xff] %v1890_v18  ;;  %v1800_v15 = vmul.f32 %v3446_v45, %v1744_v5  ;;  %v1746_v38 = vpop.f32.mrb[50].mxu1 }
 0x296   : > { %v1764_v10 = vmul.f32 %v3446_v45, %v1654_v6  ;;  %v1656_v0 = vpop.f32.mrb[42].mxu0  ;;  %v1851_v57 = vadd.f32 %v3448_v36, %v1799_v53  ;;  %v1801_v31 = vmul.f32 %v3444_v39, %v1746_v38  ;;  %v1748_v22 = vpop.f32.mrb[51].mxu1 }
 0x297   : > { %v1815_v14 = vadd.f32 %v3448_v36, %v1763_v46  ;;  %v1765_v52 = vmul.f32 %v3444_v39, %v1656_v0  ;;  %v1658_v62 = vpop.f32.mrb[43].mxu0  ;;  %v1852_v48 = vadd.f32 %v3451_v30, %v1800_v15  ;;  %v1802_v35 = vmul.f32 %v3446_v45, %v1748_v22 }
 0x298   : > { %v1816_v23 = vadd.f32 %v3451_v30, %v1764_v10  ;;  %v1766_v24 = vmul.f32 %v3446_v45, %v1658_v62  ;;  %v1891_v44 = vmax.f32 %v1851_v57, 0.0  ;;  %v1853_v51 = vadd.f32 %v3448_v36, %v1801_v31 }
 0x299   : > { %v1855_v43 = vmax.f32 %v1815_v14, 0.0  ;;  %v1817_v33 = vadd.f32 %v3448_v36, %v1765_v52  ;;  %v1892_v13 = vmax.f32 %v1852_v48, 0.0  ;;  %v1854_v60 = vadd.f32 %v3451_v30, %v1802_v35 }
 0x29a   : > { %v1856_v42 = vmax.f32 %v1816_v23, 0.0  ;;  %v1818_v7 = vadd.f32 %v3451_v30, %v1766_v24  ;;  %1931 = vst [vmem:[%s3461_s15 + $0x120] sm:$0xff] %v1891_v44  ;;  %v1893_v4 = vmax.f32 %v1853_v51, 0.0 }
 0x29b   : > { %1895 = vst [vmem:[%s3461_s15] sm:$0xff] %v1855_v43  ;;  %v1857_v50 = vmax.f32 %v1817_v33, 0.0  ;;  %1932 = vst [vmem:[%s3461_s15 + $0x128] sm:$0xff] %v1892_v13  ;;  %v1894_v37 = vmax.f32 %v1854_v60, 0.0 }
 0x29c   : > { %1896 = vst [vmem:[%s3461_s15 + $0x8] sm:$0xff] %v1856_v42  ;;  %v1858_v49 = vmax.f32 %v1818_v7, 0.0  ;;  %v1662_v47 = vpop.f32.mrb[44].mxu0  ;;  %1933 = vst [vmem:[%s3461_s15 + $0x130] sm:$0xff] %v1893_v4 }
 0x29d   : > { %1897 = vst [vmem:[%s3461_s15 + $0x10] sm:$0xff] %v1857_v50  ;;  %v1767_v56 = vmul.f32 %v3444_v39, %v1662_v47  ;;  %v1664_v9 = vpop.f32.mrb[45].mxu0  ;;  %1934 = vst [vmem:[%s3461_s15 + $0x138] sm:$0xff] %v1894_v37 }
 0x29e   : > { %1898 = vst [vmem:[%s3461_s15 + $0x18] sm:$0xff] %v1858_v49  ;;  %v1768_v17 = vmul.f32 %v3446_v45, %v1664_v9  ;;  %v1666_v16 = vpop.f32.mrb[46].mxu0 }
 0x29f   : > { %v1819_v3 = vadd.f32 %v3448_v36, %v1767_v56  ;;  %v1769_v11 = vmul.f32 %v3444_v39, %v1666_v16  ;;  %v1668_v54 = vpop.f32.mrb[47].mxu0 }
 0x2a0   : > { %v1820_v34 = vadd.f32 %v3451_v30, %v1768_v17  ;;  %v1770_v25 = vmul.f32 %v3446_v45, %v1668_v54 }
 0x2a1   : > { %v1859_v55 = vmax.f32 %v1819_v3, 0.0  ;;  %v1821_v28 = vadd.f32 %v3448_v36, %v1769_v11 }
 0x2a2   : > { %v1860_v27 = vmax.f32 %v1820_v34, 0.0  ;;  %v1822_v8 = vadd.f32 %v3451_v30, %v1770_v25 }
 0x2a3   : > { %1899 = vst [vmem:[%s3461_s15 + $0x20] sm:$0xff] %v1859_v55  ;;  %v1861_v58 = vmax.f32 %v1821_v28, 0.0 }
 0x2a4   : > { %1900 = vst [vmem:[%s3461_s15 + $0x28] sm:$0xff] %v1860_v27  ;;  %v1862_v39 = vmax.f32 %v1822_v8, 0.0 }
 0x2a5   : > { %1901 = vst [vmem:[%s3461_s15 + $0x30] sm:$0xff] %v1861_v58 }
 0x2a6   : > { %1902 = vst [vmem:[%s3461_s15 + $0x38] sm:$0xff] %v1862_v39 }
 0x2a7   : > { %2506 = shalt.err (!%p2503_p2)
}
 0x2a8   : > { %s2507_s10 = scalar_lea.hbm %s3577_s30, 5120  ;;  %s2511_s1 = scalar_lea.hbm %s3633_s7, 10240 }
 0x2a9   : > { %p2508_p13 = scmp.ne.s32.totalorder %s3577_s30, %s2507_s10  ;;  %p2512_p4 = scmp.lt.u32.totalorder %s3577_s30, %s3633_s7 }
 0x2aa   : > { %p2513_p7 = scmp.lt.u32.totalorder %s2511_s1, %s2507_s10  ;;  %p2515_p11 = scmp.lt.u32.totalorder %s2507_s10, %s3577_s30 }
 0x2ab   : > { %p2509_p6 = pnand %p2508_p13, %p3661_p0 }
 0x2ac   : > { %p2514_p8 = por %p2513_p7, %p2512_p4 }
 0x2ad   : > { %p2510_p10 = pneg %p2509_p6 }
 0x2ae   : > { %p2516_p1 = por %p2515_p11, %p2514_p8 }
 0x2b0   : > { %p2517_p3 = pnand %p2516_p1, %p2510_p10 }
 0x2b2   : > { %2520 = shalt.err (!%p2517_p3)
}
 0x2b3   : > { %s2577_s11 = smov 256   ;;  %s2578_s12 = smov 16  }
 0x2b4   : > { %2274 = dma.vmem_to_hbm [thread:$0]  (%p3661_p0), %s3580_s21, 5120, %s3577_s30, %s1936_s28, %s2577_s11, %s2577_s11, %s2578_s12  }
 0x2b5 PF: > { %s1965_s9 = sand.u32 1, %s2551_s24   ;;  %p3662_p5 = scmp.ne.s32.totalorder %s3642_s8, 0 }
 0x2b6   : > { %p3663_p9 = scmp.ge.s32.totalorder %s2563_s27, 2  ;;  %s1966_s20 = scalar_lea.sflag [#allocation4], %s1965_s9 }
 0x2b8   : > { %p2288_p12 = pnand %p3663_p9, %p3662_p5 }
 0x2ba   : > { %2546 = dma.done.wait (!%p2288_p12), %s1966_s20, 5120  }
 0x2bb   : > { %2548 = vsyncadd (!%p2288_p12), %s1966_s20, 4294962176  ;;  %p21_p2 = scmp.ge.s32.totalorder %s2729_s13, 4   ;;  %s3664_s24 = smov %s2555_s25 }
 0x2bc   : > { %s3665_s25 = smov %s2559_s26  ;;  %s3666_s26 = smov %s2738_s17 }
 0x2bd   : > { %s3667_s27 = smov %s2729_s13  ;;  %23 = sbr.rel (!%p21_p2) target bundleno = 8 (0x8), region = 101 }
 0x2c4   :  { %1971 = vsyncpa [#allocation3], 1 }
 0x2c5   :  { %1973 = vsyncpa [#allocation3 + $0x1], 1 }
 0x2c6   :  { %1974 = vsyncpa [#allocation6], 1 }
 0x2c7   :  { %1975 = vsyncpa [#allocation4], 1 }
 0x2c8   :  { %1977 = vsyncpa [#allocation4 + $0x1], 1 }

</bundles_post_ra>
